<compile_context>
chip_gen: v6e
topology: v6e:2x2x1
jax: 0.10.0
libtpu: 0.0.40
codegen_flags: <defaults>
</compile_context>

<pallas_src>
import functools

import jax
import jax.numpy as jnp
from jax import lax
from jax.experimental import pallas as pl
from jax.experimental.pallas import tpu as pltpu

# ----------------------------- model config ---------------------------------
N_FEATURES = 32            # C  (per-plane feature channels)
HIDDEN_DIM = 64            # OSGDecoder.hidden_dim
DECODER_OUTPUT_DIM = 32    # options['decoder_output_dim']  -> rgb channels
DECODER_LR_MUL = 1.0       # options['decoder_lr_mul']
OUT_DIM = 1 + DECODER_OUTPUT_DIM


# ------------------------------ Pallas kernel --------------------------------
def _osg_decoder_kernel(x_ref, w1_ref, b1_ref, w2_ref, b2_ref, out_ref):
    """Fused (plane-mean folded into matmul) -> softplus -> FC -> sigma/rgb.

    x_ref:   (3, tm, C)  tile of sampled features (all 3 planes, one batch)
    w1_ref:  (C, H)      first FC weight, PRE-SCALED by 1/3 (mean folded in)
    b1_ref:  (1, H)
    w2_ref:  (H, 1+D)
    b2_ref:  (1, 1+D)
    out_ref: (tm, 1+D)   column 0 = sigma, columns 1: = rgb
    """
    w1 = w1_ref[...]
    # mean over 3 planes folded into three accumulating MXU matmuls
    h = jnp.dot(x_ref[0], w1, preferred_element_type=jnp.float32)
    h = h + jnp.dot(x_ref[1], w1, preferred_element_type=jnp.float32)
    h = h + jnp.dot(x_ref[2], w1, preferred_element_type=jnp.float32)
    h = h + b1_ref[...]

    # softplus (torch.nn.Softplus, beta=1, threshold=20)
    h = jnp.where(h > 20.0, h, jnp.log1p(jnp.exp(jnp.minimum(h, 20.0))))

    # second linear -> (tm, 1+D)
    out = jnp.dot(h, w2_ref[...], preferred_element_type=jnp.float32) + b2_ref[...]

    # sigma = raw channel 0 ; rgb = sigmoid(channels 1:) * (1 + 2e-3) - 1e-3
    act = jax.nn.sigmoid(out) * (1.0 + 2.0 * 0.001) - 0.001
    col = lax.broadcasted_iota(jnp.int32, out.shape, 1)
    out_ref[...] = jnp.where(col == 0, out, act)   # one full-width, lane-dense store


# ------------------------------ JAX wrapper -----------------------------------
@functools.partial(jax.jit, static_argnames=("tm",))
def osg_decoder_forward(sampled_features, w1, b1, w2, b2, *, tm=2048):
    """sampled_features: (N, 3, M, C) float32.  Returns dict(rgb, sigma)."""
    N, P, M, C = sampled_features.shape
    assert P == 3 and C == w1.shape[0]
    H = w1.shape[1]
    D = w2.shape[1]            # 1 + decoder_output_dim

    # Pad M up to a multiple of the row tile instead of asserting divisibility.
    Mp = pl.cdiv(M, tm) * tm
    x = sampled_features
    if Mp != M:
        x = jnp.pad(x, ((0, 0), (0, 0), (0, Mp - M), (0, 0)))

    # Fold the 3-plane mean into the first matmul (runs on the otherwise-idle MXU).
    w1_scaled = w1 * (1.0 / 3.0)

    grid = (N, Mp // tm)
    combined = pl.pallas_call(
        _osg_decoder_kernel,
        out_shape=jax.ShapeDtypeStruct((N, Mp, D), jnp.float32),
        grid_spec=pltpu.PrefetchScalarGridSpec(
            num_scalar_prefetch=0,
            grid=grid,
            in_specs=[
                # read (N,3,M,C) directly -- no wrapper-side HBM transpose
                pl.BlockSpec((pl.Squeezed(), 3, tm, C), lambda n, i: (n, 0, i, 0)),
                pl.BlockSpec((C, H), lambda n, i: (0, 0)),
                pl.BlockSpec((1, H), lambda n, i: (0, 0)),
                pl.BlockSpec((H, D), lambda n, i: (0, 0)),
                pl.BlockSpec((1, D), lambda n, i: (0, 0)),
            ],
            out_specs=pl.BlockSpec((pl.Squeezed(), tm, D), lambda n, i: (n, i, 0)),
        ),
        compiler_params=pltpu.CompilerParams(
            dimension_semantics=("parallel", "parallel")),
    )(x, w1_scaled, b1, w2, b2)

    combined = combined[:, :M, :]                  # drop any padded rows
    sigma = combined[..., 0:1]
    rgb = combined[..., 1:]
    return {"rgb": rgb, "sigma": sigma}


# --------------------- deterministic parameter construction -------------------
def init_params(key):
    """Mirror EG3D FullyConnectedLayer init, with runtime gains folded in.

    torch: weight = randn(out, in) / lr_mul ; forward uses weight * (lr_mul/sqrt(in))
           bias   = zeros(out)              ; forward uses bias * lr_mul
    => effective weight = randn(out, in) / sqrt(in),  effective bias = 0.
    Stored transposed as (in, out) for `x @ W`.
    """
    k1, k2 = jax.random.split(key)
    w1 = (jax.random.normal(k1, (HIDDEN_DIM, N_FEATURES), jnp.float32)
          / DECODER_LR_MUL) * (DECODER_LR_MUL / jnp.sqrt(float(N_FEATURES)))
    b1 = jnp.zeros((1, HIDDEN_DIM), jnp.float32) * DECODER_LR_MUL
    w2 = (jax.random.normal(k2, (OUT_DIM, HIDDEN_DIM), jnp.float32)
          / DECODER_LR_MUL) * (DECODER_LR_MUL / jnp.sqrt(float(HIDDEN_DIM)))
    b2 = jnp.zeros((1, OUT_DIM), jnp.float32) * DECODER_LR_MUL
    return w1.T, b1, w2.T, b2   # (C,H), (1,H), (H,1+D), (1,1+D)


# ------------------------------ reference (plain JAX) --------------------------
def reference_forward(sampled_features, w1, b1, w2, b2):
    x = jnp.mean(sampled_features, axis=1)                     # (N, M, C)
    N, M, C = x.shape
    x = x.reshape(N * M, C)
    h = x @ w1 + b1
    h = jnp.where(h > 20.0, h, jnp.log1p(jnp.exp(jnp.minimum(h, 20.0))))
    out = h @ w2 + b2
    out = out.reshape(N, M, -1)
    rgb = jax.nn.sigmoid(out[..., 1:]) * (1.0 + 2.0 * 0.001) - 0.001
    sigma = out[..., 0:1]
    return {"rgb": rgb, "sigma": sigma}


# ----------------------------------- main --------------------------------------
if __name__ == "__main__":
    key = jax.random.PRNGKey(0)
    kp, kx1, kx2 = jax.random.split(key, 3)

    w1, b1, w2, b2 = init_params(kp)

    # Small, representative shapes: N=2 batches, 3 triplanes, C=32 features.
    # Case 1: M divides the tile exactly.
    N, M = 2, 256
    sf1 = jax.random.normal(kx1, (N, 3, M, N_FEATURES), jnp.float32)
    out1 = osg_decoder_forward(sf1, w1, b1, w2, b2, tm=256)
    jax.block_until_ready(out1)
    ref1 = reference_forward(sf1, w1, b1, w2, b2)
    assert out1["rgb"].shape == (N, M, DECODER_OUTPUT_DIM)
    assert out1["sigma"].shape == (N, M, 1)
    assert jnp.allclose(out1["rgb"], ref1["rgb"], atol=3e-5, rtol=3e-5)
    assert jnp.allclose(out1["sigma"], ref1["sigma"], atol=3e-5, rtol=3e-5)

    # Case 2: M does NOT divide the tile -> exercises the padding path.
    M2 = 200
    sf2 = jax.random.normal(kx2, (N, 3, M2, N_FEATURES), jnp.float32)
    out2 = osg_decoder_forward(sf2, w1, b1, w2, b2, tm=256)
    jax.block_until_ready(out2)
    ref2 = reference_forward(sf2, w1, b1, w2, b2)
    assert out2["rgb"].shape == (N, M2, DECODER_OUTPUT_DIM)
    assert out2["sigma"].shape == (N, M2, 1)
    assert jnp.allclose(out2["rgb"], ref2["rgb"], atol=3e-5, rtol=3e-5)
    assert jnp.allclose(out2["sigma"], ref2["sigma"], atol=3e-5, rtol=3e-5)

    print("KERNEL_OK")
</pallas_src>

<mosaic_0001>
module attributes {stable_mosaic.version = 11 : i64} {
  func.func @_osg_decoder_kernel(%arg0: i32, %arg1: i32, %arg2: memref<1x3x256x32xf32, #tpu.memory_space<vmem>>, %arg3: memref<32x64xf32, #tpu.memory_space<vmem>>, %arg4: memref<1x64xf32, #tpu.memory_space<vmem>>, %arg5: memref<64x33xf32, #tpu.memory_space<vmem>>, %arg6: memref<1x33xf32, #tpu.memory_space<vmem>>, %arg7: memref<1x256x33xf32, #tpu.memory_space<vmem>>) attributes {dimension_semantics = [#tpu.dimension_semantics<parallel>, #tpu.dimension_semantics<parallel>], iteration_bounds = array<i64: 2, 1>, scalar_prefetch = 0 : i64, scratch_operands = 0 : i64, tpu.core_type = #tpu.core_type<tc>, window_params = [{transform_indices = @transform_0, window_bounds = array<i64: 1, 3, 256, 32>}, {pipeline_mode = #tpu.pipeline_mode<synchronous>, transform_indices = @transform_1, window_bounds = array<i64: 32, 64>}, {pipeline_mode = #tpu.pipeline_mode<synchronous>, transform_indices = @transform_2, window_bounds = array<i64: 1, 64>}, {pipeline_mode = #tpu.pipeline_mode<synchronous>, transform_indices = @transform_3, window_bounds = array<i64: 64, 33>}, {pipeline_mode = #tpu.pipeline_mode<synchronous>, transform_indices = @transform_4, window_bounds = array<i64: 1, 33>}, {transform_indices = @transform_5, window_bounds = array<i64: 1, 256, 33>}]} {
    %c0 = arith.constant 0 : index
    %c0_0 = arith.constant 0 : index
    %0 = vector.load %arg3[%c0, %c0_0] : memref<32x64xf32, #tpu.memory_space<vmem>>, vector<32x64xf32>
    %c0_1 = arith.constant 0 : index
    %c0_2 = arith.constant 0 : index
    %c0_3 = arith.constant 0 : index
    %c0_4 = arith.constant 0 : index
    %1 = vector.load %arg2[%c0_1, %c0_2, %c0_3, %c0_4] : memref<1x3x256x32xf32, #tpu.memory_space<vmem>>, vector<1x1x256x32xf32>
    %2 = vector.shape_cast %1 : vector<1x1x256x32xf32> to vector<256x32xf32>
    %cst = arith.constant dense<0.000000e+00> : vector<256x64xf32>
    %3 = tpu.matmul %2, %0, %cst {dimension_numbers = #tpu.dot_dimension_numbers<[1], [0], [0], [1], [0, 0, 1, 1], [], []>} : vector<256x32xf32>, vector<32x64xf32>, vector<256x64xf32> -> vector<256x64xf32>
    %c0_5 = arith.constant 0 : index
    %c1 = arith.constant 1 : index
    %c0_6 = arith.constant 0 : index
    %c0_7 = arith.constant 0 : index
    %4 = vector.load %arg2[%c0_5, %c1, %c0_6, %c0_7] : memref<1x3x256x32xf32, #tpu.memory_space<vmem>>, vector<1x1x256x32xf32>
    %5 = vector.shape_cast %4 : vector<1x1x256x32xf32> to vector<256x32xf32>
    %cst_8 = arith.constant dense<0.000000e+00> : vector<256x64xf32>
    %6 = tpu.matmul %5, %0, %cst_8 {dimension_numbers = #tpu.dot_dimension_numbers<[1], [0], [0], [1], [0, 0, 1, 1], [], []>} : vector<256x32xf32>, vector<32x64xf32>, vector<256x64xf32> -> vector<256x64xf32>
    %7 = arith.addf %3, %6 : vector<256x64xf32>
    %c0_9 = arith.constant 0 : index
    %c2 = arith.constant 2 : index
    %c0_10 = arith.constant 0 : index
    %c0_11 = arith.constant 0 : index
    %8 = vector.load %arg2[%c0_9, %c2, %c0_10, %c0_11] : memref<1x3x256x32xf32, #tpu.memory_space<vmem>>, vector<1x1x256x32xf32>
    %9 = vector.shape_cast %8 : vector<1x1x256x32xf32> to vector<256x32xf32>
    %cst_12 = arith.constant dense<0.000000e+00> : vector<256x64xf32>
    %10 = tpu.matmul %9, %0, %cst_12 {dimension_numbers = #tpu.dot_dimension_numbers<[1], [0], [0], [1], [0, 0, 1, 1], [], []>} : vector<256x32xf32>, vector<32x64xf32>, vector<256x64xf32> -> vector<256x64xf32>
    %11 = arith.addf %7, %10 : vector<256x64xf32>
    %c0_13 = arith.constant 0 : index
    %c0_14 = arith.constant 0 : index
    %12 = vector.load %arg4[%c0_13, %c0_14] : memref<1x64xf32, #tpu.memory_space<vmem>>, vector<1x64xf32>
    %13 = vector.broadcast %12 : vector<1x64xf32> to vector<256x64xf32>
    %14 = arith.addf %11, %13 : vector<256x64xf32>
    %cst_15 = arith.constant 2.000000e+01 : f32
    %15 = vector.broadcast %cst_15 : f32 to vector<256x64xf32>
    %16 = arith.cmpf ogt, %14, %15 : vector<256x64xf32>
    %cst_16 = arith.constant 2.000000e+01 : f32
    %17 = vector.broadcast %cst_16 : f32 to vector<256x64xf32>
    %18 = arith.minimumf %14, %17 : vector<256x64xf32>
    %19 = math.exp %18 : vector<256x64xf32>
    %20 = math.log1p %19 : vector<256x64xf32>
    %21 = arith.select %16, %14, %20 : vector<256x64xi1>, vector<256x64xf32>
    %c0_17 = arith.constant 0 : index
    %c0_18 = arith.constant 0 : index
    %22 = vector.load %arg5[%c0_17, %c0_18] : memref<64x33xf32, #tpu.memory_space<vmem>>, vector<64x33xf32>
    %cst_19 = arith.constant dense<0.000000e+00> : vector<256x33xf32>
    %23 = tpu.matmul %21, %22, %cst_19 {dimension_numbers = #tpu.dot_dimension_numbers<[1], [0], [0], [1], [0, 0, 1, 1], [], []>} : vector<256x64xf32>, vector<64x33xf32>, vector<256x33xf32> -> vector<256x33xf32>
    %c0_20 = arith.constant 0 : index
    %c0_21 = arith.constant 0 : index
    %24 = vector.load %arg6[%c0_20, %c0_21] : memref<1x33xf32, #tpu.memory_space<vmem>>, vector<1x33xf32>
    %25 = vector.broadcast %24 : vector<1x33xf32> to vector<256x33xf32>
    %26 = arith.addf %23, %25 : vector<256x33xf32>
    %27 = arith.negf %26 : vector<256x33xf32>
    %28 = math.exp %27 : vector<256x33xf32>
    %cst_22 = arith.constant 1.000000e+00 : f32
    %29 = vector.broadcast %cst_22 : f32 to vector<256x33xf32>
    %30 = arith.addf %29, %28 : vector<256x33xf32>
    %31 = arith.divf %29, %30 : vector<256x33xf32>
    %cst_23 = arith.constant 1.002000e+00 : f32
    %32 = vector.broadcast %cst_23 : f32 to vector<256x33xf32>
    %33 = arith.mulf %31, %32 : vector<256x33xf32>
    %cst_24 = arith.constant 1.000000e-03 : f32
    %34 = vector.broadcast %cst_24 : f32 to vector<256x33xf32>
    %35 = arith.subf %33, %34 : vector<256x33xf32>
    %36 = tpu.iota {dimensions = array<i32: 1>} : vector<256x33xi32>
    %c0_i32 = arith.constant 0 : i32
    %37 = vector.broadcast %c0_i32 : i32 to vector<256x33xi32>
    %38 = arith.cmpi eq, %36, %37 : vector<256x33xi32>
    %39 = arith.select %38, %26, %35 : vector<256x33xi1>, vector<256x33xf32>
    %c0_25 = arith.constant 0 : index
    %c0_26 = arith.constant 0 : index
    %c0_27 = arith.constant 0 : index
    %40 = vector.load %arg7[%c0_25, %c0_26, %c0_27] : memref<1x256x33xf32, #tpu.memory_space<vmem>>, vector<1x256x33xf32>
    %41 = vector.shape_cast %40 : vector<1x256x33xf32> to vector<256x33xf32>
    %42 = vector.shape_cast %39 : vector<256x33xf32> to vector<1x256x33xf32>
    tpu.vector_store %arg7[%c0_25, %c0_26, %c0_27], %42 {strides = array<i32>} : memref<1x256x33xf32, #tpu.memory_space<vmem>>, vector<1x256x33xf32>,
    return
  }
  func.func @transform_0(%arg0: i32, %arg1: i32) -> (i32, i32, i32, i32) {
    %c0_i32 = arith.constant 0 : i32
    %c0_i32_0 = arith.constant 0 : i32
    %c0_i32_1 = arith.constant 0 : i32
    return %arg0, %c0_i32, %arg1, %c0_i32_0 : i32, i32, i32, i32
  }
  func.func @transform_1(%arg0: i32, %arg1: i32) -> (i32, i32) {
    %c0_i32 = arith.constant 0 : i32
    %c0_i32_0 = arith.constant 0 : i32
    %c0_i32_1 = arith.constant 0 : i32
    return %c0_i32, %c0_i32_0 : i32, i32
  }
  func.func @transform_2(%arg0: i32, %arg1: i32) -> (i32, i32) {
    %c0_i32 = arith.constant 0 : i32
    %c0_i32_0 = arith.constant 0 : i32
    %c0_i32_1 = arith.constant 0 : i32
    return %c0_i32, %c0_i32_0 : i32, i32
  }
  func.func @transform_3(%arg0: i32, %arg1: i32) -> (i32, i32) {
    %c0_i32 = arith.constant 0 : i32
    %c0_i32_0 = arith.constant 0 : i32
    %c0_i32_1 = arith.constant 0 : i32
    return %c0_i32, %c0_i32_0 : i32, i32
  }
  func.func @transform_4(%arg0: i32, %arg1: i32) -> (i32, i32) {
    %c0_i32 = arith.constant 0 : i32
    %c0_i32_0 = arith.constant 0 : i32
    %c0_i32_1 = arith.constant 0 : i32
    return %c0_i32, %c0_i32_0 : i32, i32
  }
  func.func @transform_5(%arg0: i32, %arg1: i32) -> (i32, i32, i32) {
    %c0_i32 = arith.constant 0 : i32
    %c0_i32_0 = arith.constant 0 : i32
    return %arg0, %arg1, %c0_i32 : i32, i32, i32
  }
}

</mosaic_0001>

<bundles_post_ra>
// kernel: osg_decoder_forward.1
= control target key start
LH: loop header
LB: loop body
LE: loop exit
PB: predicated region body
PF: predicated region fallthrough
CT: control target
= control target key end

     0   :  { %s3581_s18 = smov 0   ;;  %s3583_s19 = smov 0   ;;  %s4866_s0 = inlined_call_operand.vmem [shape: f32[2,3,256,32], index: 0, kind: input, shape index: {}]   ;;  %s4867_s1 = inlined_call_operand.vmem [shape: f32[32,64], index: 1, kind: input, shape index: {}]   ;;  %s4868_s2 = inlined_call_operand.vmem [shape: f32[1,64], index: 2, kind: input, shape index: {}]   ;;  %s4869_s3 = inlined_call_operand.vmem [shape: f32[64,33], index: 3, kind: input, shape index: {}]   ;;  %s4870_s4 = inlined_call_operand.vmem [shape: f32[1,33], index: 4, kind: input, shape index: {}]   ;;  %s4871_s5 = inlined_call_operand.vmem [shape: f32[2,256,33], index: 5, kind: output, shape index: {}]  }
   0x1   :  { %s3585_s20 = smov 0  }
   0x2 LB: > { %s27_s21 = sadd.s32 1, %s3545_s19  ;;  %p2601_p0 = scmp.ge.s32.totalorder %s3549_s20, 1  ;;  %s3549_s20 = sphi %s3585_s20, %s15_s20   ;;  %s3545_s19 = sphi %s3583_s19, %s4905_s19   ;;  %s3541_s18 = sphi %s3581_s18, %s4904_s18  }
   0x3   : > { %p29_p1 = scmp.ge.s32.totalorder %s27_s21, 2  ;;  %p208_p2 = scmp.lt.s32.totalorder %s3549_s20, 3 }
   0x5   : > { %s4907_s21 = smov (%p29_p1, %s27_s21), 0  ;;  %p209_p3 = pnand %p2601_p0, %p208_p2 }
   0x7   : > { %212 = sbr.rel (%p209_p3) target bundleno = 660 (0x294), region = 40 }
   0xc   : > { %v267_v0 = vld [vmem:[%s4867_s1 + $0x18] sm:$0xff]  ;;  %v266_v1 = vld [vmem:[%s4867_s1 + $0x10] sm:$0xff]  ;;  %p245_p4 = scmp.lt.s32.totalorder %s3541_s18, 1  ;;  %v265_v2 = vld [vmem:[%s4867_s1 + $0x8] sm:$0xff]  ;;  %vm333_vm0 = vcmask 261120   ;;  %vm1864_vm2 = vcmask 523264  }
   0xd   : > { %3014 = vmatprep.subr.mxu0 %v267_v0  ;;  %3070 = vmatprep.subr.mxu1 %v267_v0  ;;  %v264_v3 = vld [vmem:[%s4867_s1] sm:$0xff] }
   0xe   : > { %3015 = vmatpush3.msra.mxu0 %v267_v0  ;;  %3071 = vmatpush3.msra.mxu1 %v267_v0  ;;  %s4909_s18 = smov (!%p245_p4, %s3541_s18), 1 }
   0xf   : > { %3016 = vmatprep.subr.mxu0 %v266_v1  ;;  %3072 = vmatprep.subr.mxu1 %v266_v1  ;;  %s3246_s30 = smul.u32 768, %s4909_s18 }
  0x10   : > { %3017 = vmatpush3.msra.mxu0 %v266_v1  ;;  %3073 = vmatpush3.msra.mxu1 %v266_v1 }
  0x11   : > { %3018 = vmatprep.subr.mxu0 %v265_v2  ;;  %3074 = vmatprep.subr.mxu1 %v265_v2  ;;  %s3617_s8 = scalar_lea.vmem %s4866_s0, %s3246_s30 }
  0x12   : > { %3019 = vmatpush3.msra.mxu0 %v265_v2  ;;  %3075 = vmatpush3.msra.mxu1 %v265_v2  ;;  %v2605_v4 = vld [vmem:[%s3617_s8 + $0x100] sm:$0xff]  ;;  %v2606_v6 = vld [vmem:[%s3617_s8 + $0x108] sm:$0xff]  ;;  %v2607_v8 = vld [vmem:[%s3617_s8 + $0x110] sm:$0xff] }
  0x13   : > { %3020 = vmatprep.subr.mxu0 %v264_v3  ;;  %3076 = vmatprep.subr.mxu1 %v264_v3  ;;  %v268_v5 = vld [vmem:[%s3617_s8] sm:$0xff]  ;;  %v269_v7 = vld [vmem:[%s3617_s8 + $0x8] sm:$0xff]  ;;  %v270_v9 = vld [vmem:[%s3617_s8 + $0x10] sm:$0xff] }
  0x14   : > { %3021 = vmatpush3.msra.mxu0 %v264_v3  ;;  %3022 = vmatprep.mubr.msk.f32.mxu0 %vm333_vm0, %v2605_v4  ;;  %v2608_v10 = vld [vmem:[%s3617_s8 + $0x118] sm:$0xff]  ;;  %v2609_v12 = vld [vmem:[%s3617_s8 + $0x120] sm:$0xff]  ;;  %v2610_v14 = vld [vmem:[%s3617_s8 + $0x128] sm:$0xff] }
  0x15   : > { %3077 = vmatpush3.msra.mxu1 %v264_v3  ;;  %3078 = vmatprep.mubr.msk.f32.mxu1 %vm333_vm0, %v268_v5  ;;  %v271_v11 = vld [vmem:[%s3617_s8 + $0x18] sm:$0xff]  ;;  %v272_v13 = vld [vmem:[%s3617_s8 + $0x20] sm:$0xff]  ;;  %v273_v15 = vld [vmem:[%s3617_s8 + $0x28] sm:$0xff] }
  0x16   : > { %3023 = vmatmul.mubr.msk.f32.vlgmr.msra.gmra.mxu0 %vm333_vm0, %v2606_v6  ;;  %3079 = vmatmul.mubr.msk.f32.vlgmr.msra.gmra.mxu1 %vm333_vm0, %v269_v7  ;;  %v2611_v16 = vld [vmem:[%s3617_s8 + $0x130] sm:$0xff]  ;;  %v2612_v18 = vld [vmem:[%s3617_s8 + $0x138] sm:$0xff]  ;;  %v2613_v20 = vld [vmem:[%s3617_s8 + $0x140] sm:$0xff] }
  0x17   : > { %3126 = vmatprep.subr.mxu0 %v267_v0  ;;  %3025 = vmatprep.mubr.msk.f32.mxu0 %vm333_vm0, %v2607_v8  ;;  %v274_v17 = vld [vmem:[%s3617_s8 + $0x30] sm:$0xff]  ;;  %v275_v19 = vld [vmem:[%s3617_s8 + $0x38] sm:$0xff]  ;;  %v276_v21 = vld [vmem:[%s3617_s8 + $0x40] sm:$0xff] }
  0x18   : > { %3127 = vmatpush3.msra.mxu0 %v267_v0  ;;  %3081 = vmatprep.mubr.msk.f32.mxu1 %vm333_vm0, %v270_v9  ;;  %v2614_v22 = vld [vmem:[%s3617_s8 + $0x148] sm:$0xff]  ;;  %v2615_v24 = vld [vmem:[%s3617_s8 + $0x150] sm:$0xff]  ;;  %v2616_v26 = vld [vmem:[%s3617_s8 + $0x158] sm:$0xff] }
  0x19   : > { %3128 = vmatprep.subr.mxu0 %v266_v1  ;;  %v277_v23 = vld [vmem:[%s3617_s8 + $0x48] sm:$0xff]  ;;  %v278_v25 = vld [vmem:[%s3617_s8 + $0x50] sm:$0xff]  ;;  %v279_v27 = vld [vmem:[%s3617_s8 + $0x58] sm:$0xff] }
  0x1a   : > { %3026 = vmatmul.mubr.msk.f32.gmra.mxu0 %vm333_vm0, %v2608_v10  ;;  %3082 = vmatmul.mubr.msk.f32.gmra.mxu1 %vm333_vm0, %v271_v11  ;;  %v2617_v28 = vld [vmem:[%s3617_s8 + $0x160] sm:$0xff]  ;;  %v2618_v30 = vld [vmem:[%s3617_s8 + $0x168] sm:$0xff]  ;;  %v2619_v32 = vld [vmem:[%s3617_s8 + $0x170] sm:$0xff] }
  0x1b   : > { %3028 = vmatprep.mubr.msk.f32.mxu0 %vm333_vm0, %v2609_v12  ;;  %3084 = vmatprep.mubr.msk.f32.mxu1 %vm333_vm0, %v272_v13  ;;  %v280_v29 = vld [vmem:[%s3617_s8 + $0x60] sm:$0xff]  ;;  %v281_v31 = vld [vmem:[%s3617_s8 + $0x68] sm:$0xff]  ;;  %v282_v33 = vld [vmem:[%s3617_s8 + $0x70] sm:$0xff] }
  0x1c   : > { %3129 = vmatpush3.msra.mxu0 %v266_v1  ;;  %v2620_v34 = vld [vmem:[%s3617_s8 + $0x178] sm:$0xff]  ;;  %v2621_v36 = vld [vmem:[%s3617_s8 + $0x180] sm:$0xff]  ;;  %v2622_v38 = vld [vmem:[%s3617_s8 + $0x188] sm:$0xff] }
  0x1d   : > { %3130 = vmatprep.subr.mxu0 %v265_v2  ;;  %v283_v35 = vld [vmem:[%s3617_s8 + $0x78] sm:$0xff]  ;;  %v284_v37 = vld [vmem:[%s3617_s8 + $0x80] sm:$0xff]  ;;  %v285_v39 = vld [vmem:[%s3617_s8 + $0x88] sm:$0xff] }
  0x1e   : > { %3029 = vmatmul.mubr.msk.f32.gmra.mxu0 %vm333_vm0, %v2610_v14  ;;  %3085 = vmatmul.mubr.msk.f32.gmra.mxu1 %vm333_vm0, %v273_v15  ;;  %v2623_v40 = vld [vmem:[%s3617_s8 + $0x190] sm:$0xff]  ;;  %v2624_v42 = vld [vmem:[%s3617_s8 + $0x198] sm:$0xff]  ;;  %v2625_v44 = vld [vmem:[%s3617_s8 + $0x1a0] sm:$0xff] }
  0x1f   : > { %3031 = vmatprep.mubr.msk.f32.mxu0 %vm333_vm0, %v2611_v16  ;;  %3087 = vmatprep.mubr.msk.f32.mxu1 %vm333_vm0, %v274_v17  ;;  %v286_v41 = vld [vmem:[%s3617_s8 + $0x90] sm:$0xff]  ;;  %v287_v43 = vld [vmem:[%s3617_s8 + $0x98] sm:$0xff]  ;;  %v288_v45 = vld [vmem:[%s3617_s8 + $0xa0] sm:$0xff] }
  0x20   : > { %3131 = vmatpush3.msra.mxu0 %v265_v2  ;;  %v2626_v46 = vld [vmem:[%s3617_s8 + $0x1a8] sm:$0xff]  ;;  %v2627_v48 = vld [vmem:[%s3617_s8 + $0x1b0] sm:$0xff]  ;;  %v2628_v50 = vld [vmem:[%s3617_s8 + $0x1b8] sm:$0xff] }
  0x21   : > { %3132 = vmatprep.subr.mxu0 %v264_v3  ;;  %v289_v47 = vld [vmem:[%s3617_s8 + $0xa8] sm:$0xff]  ;;  %v290_v49 = vld [vmem:[%s3617_s8 + $0xb0] sm:$0xff]  ;;  %v291_v51 = vld [vmem:[%s3617_s8 + $0xb8] sm:$0xff] }
  0x22   : > { %3032 = vmatmul.mubr.msk.f32.gmra.mxu0 %vm333_vm0, %v2612_v18  ;;  %3088 = vmatmul.mubr.msk.f32.gmra.mxu1 %vm333_vm0, %v275_v19  ;;  %v2629_v52 = vld [vmem:[%s3617_s8 + $0x1c0] sm:$0xff]  ;;  %v2630_v54 = vld [vmem:[%s3617_s8 + $0x1c8] sm:$0xff]  ;;  %v2631_v56 = vld [vmem:[%s3617_s8 + $0x1d0] sm:$0xff] }
  0x23   : > { %3034 = vmatprep.mubr.msk.f32.mxu0 %vm333_vm0, %v2613_v20  ;;  %3090 = vmatprep.mubr.msk.f32.mxu1 %vm333_vm0, %v276_v21  ;;  %v292_v53 = vld [vmem:[%s3617_s8 + $0xc0] sm:$0xff]  ;;  %v293_v55 = vld [vmem:[%s3617_s8 + $0xc8] sm:$0xff]  ;;  %v294_v57 = vld [vmem:[%s3617_s8 + $0xd0] sm:$0xff] }
  0x24   : > { %3133 = vmatpush3.msra.mxu0 %v264_v3  ;;  %v2632_v58 = vld [vmem:[%s3617_s8 + $0x1d8] sm:$0xff]  ;;  %v2633_v60 = vld [vmem:[%s3617_s8 + $0x1e0] sm:$0xff]  ;;  %v2634_v62 = vld [vmem:[%s3617_s8 + $0x1e8] sm:$0xff] }
  0x25   : > { %v295_v59 = vld [vmem:[%s3617_s8 + $0xd8] sm:$0xff]  ;;  %v296_v61 = vld [vmem:[%s3617_s8 + $0xe0] sm:$0xff]  ;;  %v297_v63 = vld [vmem:[%s3617_s8 + $0xe8] sm:$0xff] }
  0x26   : > { %3035 = vmatmul.mubr.msk.f32.gmra.mxu0 %vm333_vm0, %v2614_v22  ;;  %3091 = vmatmul.mubr.msk.f32.gmra.mxu1 %vm333_vm0, %v277_v23  ;;  %v2635_v0 = vld [vmem:[%s3617_s8 + $0x1f0] sm:$0xff]  ;;  %v2636_v2 = vld [vmem:[%s3617_s8 + $0x1f8] sm:$0xff]  ;;  %v2701_v4 = vld [vmem:[%s3617_s8 + $0x200] sm:$0xff] }
  0x27   : > { %3037 = vmatprep.mubr.msk.f32.mxu0 %vm333_vm0, %v2615_v24  ;;  %3093 = vmatprep.mubr.msk.f32.mxu1 %vm333_vm0, %v278_v25  ;;  %v298_v1 = vld [vmem:[%s3617_s8 + $0xf0] sm:$0xff]  ;;  %v299_v3 = vld [vmem:[%s3617_s8 + $0xf8] sm:$0xff]  ;;  %v2702_v5 = vld [vmem:[%s3617_s8 + $0x208] sm:$0xff] }
  0x28   : > { %v2703_v6 = vld [vmem:[%s3617_s8 + $0x210] sm:$0xff]  ;;  %v2704_v7 = vld [vmem:[%s3617_s8 + $0x218] sm:$0xff]  ;;  %v2705_v8 = vld [vmem:[%s3617_s8 + $0x220] sm:$0xff] }
  0x29   : > { %v2706_v9 = vld [vmem:[%s3617_s8 + $0x228] sm:$0xff]  ;;  %v2707_v10 = vld [vmem:[%s3617_s8 + $0x230] sm:$0xff]  ;;  %v2708_v11 = vld [vmem:[%s3617_s8 + $0x238] sm:$0xff] }
  0x2a   : > { %3038 = vmatmul.mubr.msk.f32.gmra.mxu0 %vm333_vm0, %v2616_v26  ;;  %3094 = vmatmul.mubr.msk.f32.gmra.mxu1 %vm333_vm0, %v279_v27  ;;  %v2709_v12 = vld [vmem:[%s3617_s8 + $0x240] sm:$0xff]  ;;  %v2710_v13 = vld [vmem:[%s3617_s8 + $0x248] sm:$0xff]  ;;  %v2711_v14 = vld [vmem:[%s3617_s8 + $0x250] sm:$0xff] }
  0x2b   : > { %3040 = vmatprep.mubr.msk.f32.mxu0 %vm333_vm0, %v2617_v28  ;;  %3096 = vmatprep.mubr.msk.f32.mxu1 %vm333_vm0, %v280_v29  ;;  %v2712_v15 = vld [vmem:[%s3617_s8 + $0x258] sm:$0xff]  ;;  %v2713_v16 = vld [vmem:[%s3617_s8 + $0x260] sm:$0xff]  ;;  %v2714_v17 = vld [vmem:[%s3617_s8 + $0x268] sm:$0xff] }
  0x2c   : > { %v2715_v18 = vld [vmem:[%s3617_s8 + $0x270] sm:$0xff]  ;;  %v2716_v19 = vld [vmem:[%s3617_s8 + $0x278] sm:$0xff]  ;;  %v2717_v20 = vld [vmem:[%s3617_s8 + $0x280] sm:$0xff] }
  0x2d   : > { %v2718_v21 = vld [vmem:[%s3617_s8 + $0x288] sm:$0xff]  ;;  %v2719_v22 = vld [vmem:[%s3617_s8 + $0x290] sm:$0xff]  ;;  %v2720_v23 = vld [vmem:[%s3617_s8 + $0x298] sm:$0xff] }
  0x2e   : > { %3041 = vmatmul.mubr.msk.f32.gmra.mxu0 %vm333_vm0, %v2618_v30  ;;  %3097 = vmatmul.mubr.msk.f32.gmra.mxu1 %vm333_vm0, %v281_v31  ;;  %v2721_v24 = vld [vmem:[%s3617_s8 + $0x2a0] sm:$0xff]  ;;  %v2722_v25 = vld [vmem:[%s3617_s8 + $0x2a8] sm:$0xff]  ;;  %v2723_v26 = vld [vmem:[%s3617_s8 + $0x2b0] sm:$0xff] }
  0x2f   : > { %3043 = vmatprep.mubr.msk.f32.mxu0 %vm333_vm0, %v2619_v32  ;;  %3099 = vmatprep.mubr.msk.f32.mxu1 %vm333_vm0, %v282_v33  ;;  %v2724_v27 = vld [vmem:[%s3617_s8 + $0x2b8] sm:$0xff]  ;;  %v2725_v28 = vld [vmem:[%s3617_s8 + $0x2c0] sm:$0xff]  ;;  %v2726_v29 = vld [vmem:[%s3617_s8 + $0x2c8] sm:$0xff] }
  0x30   : > { %v2727_v30 = vld [vmem:[%s3617_s8 + $0x2d0] sm:$0xff]  ;;  %v1856_v31 = vld [vmem:[%s4869_s3 + $0x38] sm:$0xff]  ;;  %v2729_v33 = vld [vmem:[%s3617_s8 + $0x2e0] sm:$0xff] }
  0x31   : > { %3182 = vmatprep.subr.mxu1 %v1856_v31  ;;  %v2728_v32 = vld [vmem:[%s3617_s8 + $0x2d8] sm:$0xff] }
  0x32   : > { %3044 = vmatmul.mubr.msk.f32.gmra.mxu0 %vm333_vm0, %v2620_v34  ;;  %3100 = vmatmul.mubr.msk.f32.gmra.mxu1 %vm333_vm0, %v283_v35  ;;  %v2730_v34 = vld [vmem:[%s3617_s8 + $0x2e8] sm:$0xff]  ;;  %v2731_v35 = vld [vmem:[%s3617_s8 + $0x2f0] sm:$0xff] }
  0x33   : > { %3046 = vmatprep.mubr.msk.f32.mxu0 %vm333_vm0, %v2621_v36  ;;  %3102 = vmatprep.mubr.msk.f32.mxu1 %vm333_vm0, %v284_v37  ;;  %v1855_v36 = vld [vmem:[%s4869_s3 + $0x30] sm:$0xff]  ;;  %v2732_v37 = vld [vmem:[%s3617_s8 + $0x2f8] sm:$0xff]  ;;  %s2865_s8 = sshll.u32 %s4909_s18, 8 }
  0x34   : > { %3183 = vmatpush3.msra.mxu1 %v1856_v31  ;;  %s4596_s11 = scalar_lea.vmem %s4871_s5, %s2865_s8 }
  0x35   : > { %3184 = vmatprep.subr.mxu1 %v1855_v36 }
  0x36   : > { %3047 = vmatmul.mubr.msk.f32.gmra.mxu0 %vm333_vm0, %v2622_v38  ;;  %3103 = vmatmul.mubr.msk.f32.gmra.mxu1 %vm333_vm0, %v285_v39  ;;  %v1854_v38 = vld [vmem:[%s4869_s3 + $0x28] sm:$0xff]  ;;  %v1853_v39 = vld [vmem:[%s4869_s3 + $0x20] sm:$0xff] }
  0x37   : > { %3049 = vmatprep.mubr.msk.f32.mxu0 %vm333_vm0, %v2623_v40  ;;  %3105 = vmatprep.mubr.msk.f32.mxu1 %vm333_vm0, %v286_v41  ;;  %v1852_v40 = vld [vmem:[%s4869_s3 + $0x18] sm:$0xff]  ;;  %v1851_v41 = vld [vmem:[%s4869_s3 + $0x10] sm:$0xff] }
  0x38   : > { %3185 = vmatpush3.msra.mxu1 %v1855_v36 }
  0x39   : > { %3186 = vmatprep.subr.mxu1 %v1854_v38 }
  0x3a   : > { %3050 = vmatmul.mubr.msk.f32.gmra.mxu0 %vm333_vm0, %v2624_v42  ;;  %3106 = vmatmul.mubr.msk.f32.gmra.mxu1 %vm333_vm0, %v287_v43  ;;  %v1850_v42 = vld [vmem:[%s4869_s3 + $0x8] sm:$0xff]  ;;  %v1849_v43 = vld [vmem:[%s4869_s3] sm:$0xff] }
  0x3b   : > { %3052 = vmatprep.mubr.msk.f32.mxu0 %vm333_vm0, %v2625_v44  ;;  %3108 = vmatprep.mubr.msk.f32.mxu1 %vm333_vm0, %v288_v45 }
  0x3c   : > { %3187 = vmatpush3.msra.mxu1 %v1854_v38 }
  0x3d   : > { %3188 = vmatprep.subr.mxu1 %v1853_v39 }
  0x3e   : > { %3053 = vmatmul.mubr.msk.f32.gmra.mxu0 %vm333_vm0, %v2626_v46  ;;  %3109 = vmatmul.mubr.msk.f32.gmra.mxu1 %vm333_vm0, %v289_v47 }
  0x3f   : > { %3055 = vmatprep.mubr.msk.f32.mxu0 %vm333_vm0, %v2627_v48  ;;  %3111 = vmatprep.mubr.msk.f32.mxu1 %vm333_vm0, %v290_v49 }
  0x40   : > { %3189 = vmatpush3.msra.mxu1 %v1853_v39 }
  0x41   : > { %3190 = vmatprep.subr.mxu1 %v1852_v40 }
  0x42   : > { %3056 = vmatmul.mubr.msk.f32.gmra.mxu0 %vm333_vm0, %v2628_v50  ;;  %3112 = vmatmul.mubr.msk.f32.gmra.mxu1 %vm333_vm0, %v291_v51 }
  0x43   : > { %3058 = vmatprep.mubr.msk.f32.mxu0 %vm333_vm0, %v2629_v52  ;;  %3114 = vmatprep.mubr.msk.f32.mxu1 %vm333_vm0, %v292_v53 }
  0x44   : > { %3191 = vmatpush3.msra.mxu1 %v1852_v40 }
  0x45   : > { %3192 = vmatprep.subr.mxu1 %v1851_v41 }
  0x46   : > { %3059 = vmatmul.mubr.msk.f32.gmra.mxu0 %vm333_vm0, %v2630_v54  ;;  %3115 = vmatmul.mubr.msk.f32.gmra.mxu1 %vm333_vm0, %v293_v55 }
  0x47   : > { %3061 = vmatprep.mubr.msk.f32.mxu0 %vm333_vm0, %v2631_v56  ;;  %3117 = vmatprep.mubr.msk.f32.mxu1 %vm333_vm0, %v294_v57 }
  0x48   : > { %3193 = vmatpush3.msra.mxu1 %v1851_v41 }
  0x49   : > { %3194 = vmatprep.subr.mxu1 %v1850_v42 }
  0x4a   : > { %3062 = vmatmul.mubr.msk.f32.gmra.mxu0 %vm333_vm0, %v2632_v58  ;;  %3118 = vmatmul.mubr.msk.f32.gmra.mxu1 %vm333_vm0, %v295_v59 }
  0x4b   : > { %3064 = vmatprep.mubr.msk.f32.mxu0 %vm333_vm0, %v2633_v60  ;;  %3120 = vmatprep.mubr.msk.f32.mxu1 %vm333_vm0, %v296_v61 }
  0x4c   : > { %3195 = vmatpush3.msra.mxu1 %v1850_v42 }
  0x4d   : > { %3196 = vmatprep.subr.mxu1 %v1849_v43 }
  0x4e   : > { %3065 = vmatmul.mubr.msk.f32.gmra.mxu0 %vm333_vm0, %v2634_v62  ;;  %3121 = vmatmul.mubr.msk.f32.gmra.mxu1 %vm333_vm0, %v297_v63 }
  0x4f   : > { %3067 = vmatprep.mubr.msk.f32.mxu0 %vm333_vm0, %v2635_v0  ;;  %3123 = vmatprep.mubr.msk.f32.mxu1 %vm333_vm0, %v298_v1 }
  0x50   : > { %3197 = vmatpush3.msra.mxu1 %v1849_v43 }
  0x52   : > { %3068 = vmatmul.mubr.msk.f32.gmra.mxu0 %vm333_vm0, %v2636_v2  ;;  %3124 = vmatmul.mubr.msk.f32.gmra.mxu1 %vm333_vm0, %v299_v3 }
  0x53   : > { %3134 = vmatprep.mubr.msk.f32.mxu0 %vm333_vm0, %v2701_v4 }
  0x56   : > { %3135 = vmatmul.mubr.msk.f32.vlgmr.msra.gmra.mxu0 %vm333_vm0, %v2702_v5 }
  0x57   : > { %3137 = vmatprep.mubr.msk.f32.mxu0 %vm333_vm0, %v2703_v6 }
  0x5a   : > { %3138 = vmatmul.mubr.msk.f32.gmra.mxu0 %vm333_vm0, %v2704_v7 }
  0x5b   : > { %3140 = vmatprep.mubr.msk.f32.mxu0 %vm333_vm0, %v2705_v8 }
  0x5e   : > { %3141 = vmatmul.mubr.msk.f32.gmra.mxu0 %vm333_vm0, %v2706_v9 }
  0x5f   : > { %3143 = vmatprep.mubr.msk.f32.mxu0 %vm333_vm0, %v2707_v10 }
  0x62   : > { %3144 = vmatmul.mubr.msk.f32.gmra.mxu0 %vm333_vm0, %v2708_v11 }
  0x63   : > { %3146 = vmatprep.mubr.msk.f32.mxu0 %vm333_vm0, %v2709_v12 }
  0x66   : > { %3147 = vmatmul.mubr.msk.f32.gmra.mxu0 %vm333_vm0, %v2710_v13 }
  0x67   : > { %3149 = vmatprep.mubr.msk.f32.mxu0 %vm333_vm0, %v2711_v14 }
  0x6a   : > { %3150 = vmatmul.mubr.msk.f32.gmra.mxu0 %vm333_vm0, %v2712_v15 }
  0x6b   : > { %3152 = vmatprep.mubr.msk.f32.mxu0 %vm333_vm0, %v2713_v16 }
  0x6e   : > { %3153 = vmatmul.mubr.msk.f32.gmra.mxu0 %vm333_vm0, %v2714_v17 }
  0x6f   : > { %3155 = vmatprep.mubr.msk.f32.mxu0 %vm333_vm0, %v2715_v18 }
  0x72   : > { %3156 = vmatmul.mubr.msk.f32.gmra.mxu0 %vm333_vm0, %v2716_v19 }
  0x73   : > { %3158 = vmatprep.mubr.msk.f32.mxu0 %vm333_vm0, %v2717_v20 }
  0x76   : > { %3159 = vmatmul.mubr.msk.f32.gmra.mxu0 %vm333_vm0, %v2718_v21 }
  0x77   : > { %3161 = vmatprep.mubr.msk.f32.mxu0 %vm333_vm0, %v2719_v22 }
  0x7a   : > { %3162 = vmatmul.mubr.msk.f32.gmra.mxu0 %vm333_vm0, %v2720_v23 }
  0x7b   : > { %3164 = vmatprep.mubr.msk.f32.mxu0 %vm333_vm0, %v2721_v24 }
  0x7e   : > { %3165 = vmatmul.mubr.msk.f32.gmra.mxu0 %vm333_vm0, %v2722_v25 }
  0x7f   : > { %3167 = vmatprep.mubr.msk.f32.mxu0 %vm333_vm0, %v2723_v26 }
  0x82   : > { %3168 = vmatmul.mubr.msk.f32.gmra.mxu0 %vm333_vm0, %v2724_v27 }
  0x83   : > { %3170 = vmatprep.mubr.msk.f32.mxu0 %vm333_vm0, %v2725_v28 }
  0x86   : > { %3171 = vmatmul.mubr.msk.f32.gmra.mxu0 %vm333_vm0, %v2726_v29 }
  0x87   : > { %3173 = vmatprep.mubr.msk.f32.mxu0 %vm333_vm0, %v2727_v30 }
  0x8a   : > { %3174 = vmatmul.mubr.msk.f32.gmra.mxu0 %vm333_vm0, %v2728_v32 }
  0x8b   : > { %3176 = vmatprep.mubr.msk.f32.mxu0 %vm333_vm0, %v2729_v33 }
  0x8e   : > { %3177 = vmatmul.mubr.msk.f32.gmra.mxu0 %vm333_vm0, %v2730_v34 }
  0x8f   : > { %3179 = vmatprep.mubr.msk.f32.mxu0 %vm333_vm0, %v2731_v35  ;;  %v3928_v35 = vld [vmem:[%s4868_s2] ss:$0 sm:$0xff] }
  0x92   : > { %3180 = vmatmul.mubr.msk.f32.gmra.mxu0 %vm333_vm0, %v2732_v37 }
  0xd6   : > { %v3024_v44 = vpop.f32.mrf.mxu0  ;;  %v3080_v45 = vpop.f32.mrf.mxu1 }
  0xd7   : > { %v823_v32 = vadd.f32 %v3080_v45, %v3024_v44 }
  0xd8   : > { %v496_v46 = vpop.f32.mrf.mxu0  ;;  %v817_v47 = vpop.f32.mrf.mxu1 }
  0xd9   : > { %v818_v36 = vadd.f32 %v817_v47, %v496_v46 }
  0xda   : > { %v3027_v48 = vpop.f32.mrf.mxu0  ;;  %v3083_v49 = vpop.f32.mrf.mxu1 }
  0xdb   : > { %v833_v39 = vadd.f32 %v3083_v49, %v3027_v48 }
  0xdc   : > { %v506_v50 = vpop.f32.mrf.mxu0  ;;  %v827_v51 = vpop.f32.mrf.mxu1 }
  0xdd   : > { %v828_v44 = vadd.f32 %v827_v51, %v506_v50 }
  0xde   : > { %v3835_v52 = vpop.f32.mrf.mxu0  ;;  %v3837_v53 = vpop.f32.mrf.mxu1 }
  0xdf   : > { %v843_v48 = vadd.f32 %v3837_v53, %v3835_v52 }
  0xe0   : > { %v3839_v54 = vpop.f32.mrf.mxu0  ;;  %v3841_v55 = vpop.f32.mrf.mxu1 }
  0xe1   : > { %v838_v51 = vadd.f32 %v3841_v55, %v3839_v54 }
  0xe2   : > { %v3843_v56 = vpop.f32.mrf.mxu0  ;;  %v3845_v57 = vpop.f32.mrf.mxu1 }
  0xe4   : > { %v3847_v58 = vpop.f32.mrf.mxu0  ;;  %v3849_v59 = vpop.f32.mrf.mxu1 }
  0xe6   : > { %v3851_v60 = vpop.f32.mrf.mxu0  ;;  %v3853_v61 = vpop.f32.mrf.mxu1 }
  0xe8   : > { %v3855_v62 = vpop.f32.mrf.mxu0  ;;  %v3857_v63 = vpop.f32.mrf.mxu1 }
  0xea   : > { %v3859_v0 = vpop.f32.mrf.mxu0  ;;  %v3863_v2 = vpop.f32.mrf.mxu1 }
  0xec   : > { %v3861_v1 = vpop.f32.mrf.mxu0  ;;  %v3869_v5 = vpop.f32.mrf.mxu1 }
  0xee   : > { %v3865_v3 = vpop.f32.mrf.mxu0  ;;  %v3875_v8 = vpop.f32.mrf.mxu1 }
  0xf0   : > { %v3867_v4 = vpop.f32.mrf.mxu0  ;;  %v3881_v11 = vpop.f32.mrf.mxu1 }
  0xf2   : > { %v3871_v6 = vpop.f32.mrf.mxu0  ;;  %v3887_v14 = vpop.f32.mrf.mxu1 }
  0xf4   : > { %v3873_v7 = vpop.f32.mrf.mxu0  ;;  %v3893_v17 = vpop.f32.mrf.mxu1 }
  0xf6   : > { %v3877_v9 = vpop.f32.mrf.mxu0  ;;  %v3899_v20 = vpop.f32.mrf.mxu1 }
  0xf8   : > { %v3879_v10 = vpop.f32.mrf.mxu0  ;;  %v3905_v23 = vpop.f32.mrf.mxu1 }
  0xfa   : > { %v3883_v12 = vpop.f32.mrf.mxu0  ;;  %v3911_v26 = vpop.f32.mrf.mxu1 }
  0xfc   : > { %v3885_v13 = vpop.f32.mrf.mxu0  ;;  %v3917_v29 = vpop.f32.mrf.mxu1 }
  0xfe   : > { %v3889_v15 = vpop.f32.mrf.mxu0  ;;  %v3923_v33 = vpop.f32.mrf.mxu1 }
 0x100   : > { %v3891_v16 = vpop.f32.mrf.mxu0  ;;  %v3933_v42 = vpop.f32.mrf.mxu1 }
 0x102   : > { %v3895_v18 = vpop.f32.mrf.mxu0  ;;  %v3942_v49 = vpop.f32.mrf.mxu1 }
 0x104   : > { %v3897_v19 = vpop.f32.mrf.mxu0 }
 0x106   : > { %v3901_v21 = vpop.f32.mrf.mxu0 }
 0x108   : > { %v3903_v22 = vpop.f32.mrf.mxu0 }
 0x10a   : > { %v3907_v24 = vpop.f32.mrf.mxu0 }
 0x10c   : > { %v3909_v25 = vpop.f32.mrf.mxu0 }
 0x10e   : > { %v3913_v27 = vpop.f32.mrf.mxu0 }
 0x10f   : > { %4872 = vst [vmem:[#allocation2_spill] sm:$0xff] %v3913_v27 }
 0x110   : > { %v3915_v28 = vpop.f32.mrf.mxu0 }
 0x111   : > { %4873 = vst [vmem:[#allocation3_spill] sm:$0xff] %v3915_v28 }
 0x112   : > { %v3919_v30 = vpop.f32.mrf.mxu0 }
 0x113   : > { %4874 = vst [vmem:[#allocation4_spill] sm:$0xff] %v3919_v30 }
 0x114   : > { %v3921_v31 = vpop.f32.mrf.mxu0 }
 0x115   : > { %4875 = vst [vmem:[#allocation5_spill] sm:$0xff] %v3921_v31 }
 0x116   : > { %v3136_v34 = vpop.f32.mrf.mxu0 }
 0x117   : > { %v1331_v37 = vadd.f32 %v3136_v34, %v823_v32 }
 0x118   : > { %v1171_v38 = vpop.f32.mrf.mxu0 }
 0x119   : > { %v3931_v40 = vadd.f32 %v3928_v35, %v1331_v37  ;;  %v1330_v41 = vadd.f32 %v1171_v38, %v818_v36 }
 0x11a   : > { %v3139_v43 = vpop.f32.mrf.mxu0 }
 0x11b   : > { %v1434_v45 = vmin.f32 %v3931_v40, 20.0  ;;  %v3937_v31 = vadd.f32 %v3928_v35, %v1330_v41  ;;  %v1333_v30 = vadd.f32 %v3139_v43, %v833_v39  ;;  %vm1402_vm3 = vcmp.gt.f32.partialorder %v3931_v40, 20.0 }
 0x11c   : > { %v1181_v28 = vpop.f32.mrf.mxu0 }
 0x11d   : > { %v1467_v27 = vmul.f32 1.442695, %v1434_v45  ;;  %v1433_v46 = vmin.f32 %v3937_v31, 20.0  ;;  %v1332_v47 = vadd.f32 %v1181_v28, %v828_v44  ;;  %v3945_v32 = vadd.f32 %v3928_v35, %v1333_v30  ;;  %v3955_v30 = vpop.f32.mrf.mxu1 }
 0x11e   : > { %v3142_v50 = vpop.f32.mrf.mxu0  ;;  %v853_v28 = vadd.f32 %v3845_v57, %v3843_v56  ;;  %v863_v57 = vadd.f32 %v3853_v61, %v3851_v60  ;;  %v868_v60 = vadd.f32 %v3869_v5, %v3861_v1  ;;  %vm1401_vm4 = vcmp.gt.f32.partialorder %v3937_v31, 20.0 }
 0x11f   : > { %3271 = vpow2.f32 %v1467_v27  ;;  %v1465_v34 = vmul.f32 1.442695, %v1433_v46  ;;  %v3950_v36 = vadd.f32 %v3928_v35, %v1332_v47  ;;  %v1335_v37 = vadd.f32 %v3142_v50, %v843_v48  ;;  %v3116_v46 = vpop.f32.mrf.mxu1 }
 0x120   : > { %v1191_v38 = vpop.f32.mrf.mxu0  ;;  %v1436_v39 = vmin.f32 %v3945_v32, 20.0  ;;  %v848_v27 = vadd.f32 %v3849_v59, %v3847_v58  ;;  %v858_v58 = vadd.f32 %v3857_v63, %v3855_v62  ;;  %v893_v62 = vadd.f32 %v3887_v14, %v3871_v6 }
 0x121   : > { %3273 = vpow2.f32 %v1465_v34  ;;  %v1435_v52 = vmin.f32 %v3950_v36, 20.0  ;;  %v1334_v53 = vadd.f32 %v1191_v38, %v838_v51  ;;  %v3959_v54 = vadd.f32 %v3928_v35, %v1335_v37 }
 0x122   : > { %v3145_v55 = vpop.f32.mrf.mxu0  ;;  %v1471_v47 = vmul.f32 1.442695, %v1436_v39  ;;  %v873_v34 = vadd.f32 %v3863_v2, %v3859_v0  ;;  %v937_v0 = vpop.f32.mrf.mxu1  ;;  %v3994_v39 = vadd.f32 %v3893_v17, %v3873_v7  ;;  %vm1403_vm6 = vcmp.gt.f32.partialorder %v3950_v36, 20.0 }
 0x123   : > { %v1469_v41 = vmul.f32 1.442695, %v1435_v52  ;;  %v1337_v43 = vadd.f32 %v3145_v55, %v853_v28  ;;  %v3964_v44 = vadd.f32 %v3928_v35, %v1334_v53  ;;  %v1438_v48 = vmin.f32 %v3959_v54, 20.0 }
 0x124   : > { %v1201_v56 = vpop.f32.mrf.mxu0  ;;  %v883_v28 = vadd.f32 %v3875_v8, %v3865_v3  ;;  %v878_v52 = vadd.f32 %v3881_v11, %v3867_v4  ;;  %v3998_v3 = vadd.f32 %v3899_v20, %v3877_v9  ;;  %v4002_v4 = vadd.f32 %v3905_v23, %v3879_v10 }
 0x125   : > { %v1336_v45 = vadd.f32 %v1201_v56, %v848_v27  ;;  %3275 = vpow2.f32 %v1469_v41  ;;  %v3970_v50 = vadd.f32 %v3928_v35, %v1337_v43  ;;  %v1437_v61 = vmin.f32 %v3964_v44, 20.0 }
 0x126   : > { %v3148_v51 = vpop.f32.mrf.mxu0  ;;  %3277 = vpow2.f32 %v1471_v47  ;;  %v1475_v1 = vmul.f32 1.442695, %v1438_v48  ;;  %v4008_v11 = vadd.f32 %v3911_v26, %v3883_v12  ;;  %v4016_v9 = vadd.f32 %v3917_v29, %v3885_v13  ;;  %v3119_v26 = vpop.f32.mrf.mxu1 }
 0x127   : > { %v1339_v59 = vadd.f32 %v3148_v51, %v863_v57  ;;  %v3980_v37 = vadd.f32 %v3928_v35, %v1336_v45  ;;  %v1440_v2 = vmin.f32 %v3970_v50, 20.0  ;;  %v1473_v14 = vmul.f32 1.442695, %v1437_v61 }
 0x128   : > { %v1211_v38 = vpop.f32.mrf.mxu0  ;;  %v4020_v10 = vadd.f32 %v3923_v33, %v3889_v15  ;;  %3279 = vpow2.f32 %v1475_v1  ;;  %v4031_v13 = vadd.f32 %v3933_v42, %v3891_v16  ;;  %v4036_v33 = vadd.f32 %v3942_v49, %v3895_v18  ;;  %v947_v18 = vpop.f32.mrf.mxu1 }
 0x129   : > { %v3989_v63 = vadd.f32 %v3928_v35, %v1339_v59  ;;  %v1338_v5 = vadd.f32 %v1211_v38, %v858_v58  ;;  %v1439_v55 = vmin.f32 %v3980_v37, 20.0  ;;  %v1479_v27 = vmul.f32 1.442695, %v1440_v2 }
 0x12a   : > { %v3151_v53 = vpop.f32.mrf.mxu0  ;;  %v4045_v42 = vadd.f32 %v3955_v30, %v3897_v19  ;;  %v4048_v59 = vadd.f32 %v3116_v46, %v3901_v21  ;;  %v4064_v46 = vadd.f32 %v3119_v26, %v3907_v24  ;;  %v4076_v24 = vadd.f32 %v947_v18, %v3909_v25 }
 0x12b   : > { %v1341_v6 = vadd.f32 %v3151_v53, %v873_v34  ;;  %v4012_v7 = vadd.f32 %v3928_v35, %v1338_v5  ;;  %v1442_v12 = vmin.f32 %v3989_v63, 20.0  ;;  %v1477_v57 = vmul.f32 1.442695, %v1439_v55  ;;  %v3122_v5 = vpop.f32.mrf.mxu1 }
 0x12c   : > { %v4004_v8 = vpop.eup %3271  ;;  %v1221_v17 = vpop.f32.mrf.mxu0  ;;  %vm1404_vm9 = vcmp.gt.f32.partialorder %v3945_v32, 20.0  ;;  %vm1405_vm11 = vcmp.gt.f32.partialorder %v3964_v44, 20.0  ;;  %vm1406_vm12 = vcmp.gt.f32.partialorder %v3959_v54, 20.0  ;;  %vm1407_vm13 = vcmp.gt.f32.partialorder %v3980_v37, 20.0 }
 0x12d   : > { %v1538_v20 = vadd.f32 1.0, %v4004_v8  ;;  %v4027_v41 = vadd.f32 %v3928_v35, %v1341_v6  ;;  %v1340_v43 = vadd.f32 %v1221_v17, %v868_v60  ;;  %v1441_v15 = vmin.f32 %v4012_v7, 20.0 }
 0x12e   : > { %v4024_v23 = vpop.eup %3273  ;;  %v3154_v56 = vpop.f32.mrf.mxu0  ;;  %v1483_v48 = vmul.f32 1.442695, %v1442_v12  ;;  %v1541_v19 = vmul.f32 -0.5, %v4004_v8  ;;  %v1544_v1 = vand.u32 2147483647, %v4004_v8  ;;  %vm1408_vm0 = vcmp.gt.f32.partialorder %v3970_v50, 20.0 }
 0x12f   : > { %3281 = vlog2.f32 %v1538_v20  ;;  %v1343_v29 = vadd.f32 %v3154_v56, %v883_v28  ;;  %v4039_v45 = vadd.f32 %v3928_v35, %v1340_v43  ;;  %v1444_v51 = vmin.f32 %v4027_v41, 20.0  ;;  %v4876_v43 = vld [vmem:[#allocation2_spill] sm:$0xff] }
 0x130   : > { %3283 = vpow2.f32 %v1473_v14  ;;  %v1231_v47 = vpop.f32.mrf.mxu0  ;;  %v1529_v16 = vadd.f32 1.0, %v4024_v23  ;;  %v1481_v61 = vmul.f32 1.442695, %v1441_v15  ;;  %v1532_v53 = vmul.f32 -0.5, %v4024_v23 }
 0x131   : > { %v1342_v58 = vadd.f32 %v1231_v47, %v878_v52  ;;  %3285 = vpow2.f32 %v1479_v27  ;;  %v4051_v49 = vadd.f32 %v3928_v35, %v1343_v29  ;;  %v1443_v38 = vmin.f32 %v4039_v45, 20.0 }
 0x132   : > { %v3157_v34 = vpop.f32.mrf.mxu0  ;;  %v4053_v60 = vpop.eup %3275  ;;  %3287 = vlog2.f32 %v1529_v16  ;;  %v4057_v52 = vadd.f32 %v937_v0, %v3903_v22  ;;  %v1487_v2 = vmul.f32 1.442695, %v1444_v51  ;;  %v1542_v20 = vadd.f32 1.0, %v1541_v19 }
 0x133   : > { %v1345_v28 = vadd.f32 %v3157_v34, %v893_v62  ;;  %3289 = vpow2.f32 %v1477_v57  ;;  %v4061_v21 = vadd.f32 %v3928_v35, %v1342_v58  ;;  %v1446_v62 = vmin.f32 %v4051_v49, 20.0  ;;  %v4073_v14 = vpop.eup %3277 }
 0x134   : > { %v1241_v30 = vpop.f32.mrf.mxu0  ;;  %3291 = vpow2.f32 %v1483_v48  ;;  %v1547_v6 = vadd.f32 1.0, %v4053_v60  ;;  %v1485_v55 = vmul.f32 1.442695, %v1443_v38  ;;  %v4082_v56 = vadd.f32 %v3122_v5, %v4876_v43 }
 0x135   : > { %v4069_v22 = vadd.f32 %v3928_v35, %v1345_v28  ;;  %3293 = vpow2.f32 %v1481_v61  ;;  %v1344_v17 = vadd.f32 %v1241_v30, %v3994_v39  ;;  %v1445_v12 = vmin.f32 %v4061_v21, 20.0 }
 0x136   : > { %v3160_v0 = vpop.f32.mrf.mxu0  ;;  %3295 = vlog2.f32 %v1547_v6  ;;  %vm4084_vm1 = vcmp.lt.f32.partialorder %v1544_v1, 0.0004427343  ;;  %v1491_v29 = vmul.f32 1.442695, %v1446_v62  ;;  %v1533_v47 = vadd.f32 1.0, %v1532_v53 }
 0x137   : > { %v1347_v26 = vadd.f32 %v3160_v0, %v3998_v3  ;;  %3297 = vpow2.f32 %v1487_v2  ;;  %v1448_v39 = vmin.f32 %v4069_v22, 20.0  ;;  %v1556_v48 = vadd.f32 1.0, %v4073_v14  ;;  %v4091_v3 = vpop.eup %3279 }
 0x138   : > { %v1251_v27 = vpop.f32.mrf.mxu0  ;;  %3299 = vpow2.f32 %v1485_v55  ;;  %v4094_v51 = vadd.f32 %v3928_v35, %v1344_v17  ;;  %v1543_v18 = vmul.f32 %v4004_v8, %v1542_v20  ;;  %v1489_v34 = vmul.f32 1.442695, %v1445_v12 }
 0x139   : > { %v1346_v25 = vadd.f32 %v1251_v27, %v4002_v4  ;;  %v4097_v58 = vadd.f32 %v3928_v35, %v1347_v26  ;;  %v1535_v38 = vand.u32 2147483647, %v4024_v23  ;;  %3301 = vlog2.f32 %v1556_v48 }
 0x13a   : > { %v3163_v57 = vpop.f32.mrf.mxu0  ;;  %v1553_v1 = vand.u32 2147483647, %v4053_v60  ;;  %3303 = vpow2.f32 %v1491_v29  ;;  %v1495_v2 = vmul.f32 1.442695, %v1448_v39  ;;  %v1534_v62 = vmul.f32 %v4024_v23, %v1533_v47 }
 0x13b   : > { %v1349_v16 = vadd.f32 %v3163_v57, %v4008_v11  ;;  %v4107_v30 = vadd.f32 %v3928_v35, %v1346_v25  ;;  %v1550_v11 = vmul.f32 -0.5, %v4053_v60  ;;  %v1447_v53 = vmin.f32 %v4094_v51, 20.0 }
 0x13c   : > { %v3282_v4 = vpop.eup %3281  ;;  %v1261_v61 = vpop.f32.mrf.mxu0  ;;  %v1450_v6 = vmin.f32 %v4097_v58, 20.0  ;;  %3305 = vpow2.f32 %v1489_v34  ;;  %vm4124_vm5 = vcmp.lt.f32.partialorder %v1535_v38, 0.0004427343  ;;  %v1559_v23 = vmul.f32 -0.5, %v4073_v14 }
 0x13d   : > { %v4104_v28 = vpop.eup %3283  ;;  %v1540_v19 = vmul.f32 0.6931472, %v3282_v4  ;;  %v1348_v8 = vadd.f32 %v1261_v61, %v4016_v9  ;;  %v4118_v55 = vadd.f32 %v3928_v35, %v1349_v16  ;;  %v1551_v25 = vadd.f32 1.0, %v1550_v11 }
 0x13e   : > { %v3166_v5 = vpop.f32.mrf.mxu0  ;;  %v4113_v0 = vpop.eup %3285  ;;  %vm4135_vm7 = vcmp.lt.f32.partialorder %v1553_v1, 0.0004427343  ;;  %v1565_v4 = vadd.f32 1.0, %v4104_v28  ;;  %3307 = vpow2.f32 %v1495_v2  ;;  %v1493_v15 = vmul.f32 1.442695, %v1447_v53 }
 0x13f   : > { %v1351_v17 = vadd.f32 %v3166_v5, %v4020_v10  ;;  %v3288_v20 = vpop.eup %3287  ;;  %v4122_v12 = vadd.f32 %v3928_v35, %v1348_v8  ;;  %v1546_v43 = vsel %vm4084_vm1, %v1543_v18, %v1540_v19  ;;  %v1449_v10 = vmin.f32 %v4107_v30, 20.0 }
 0x140   : > { %v1271_v9 = vpop.f32.mrf.mxu0  ;;  %v4130_v27 = vpop.eup %3289  ;;  %v1531_v16 = vmul.f32 0.6931472, %v3288_v20  ;;  %v1499_v18 = vmul.f32 1.442695, %v1450_v6  ;;  %v1452_v34 = vmin.f32 %v4118_v55, 20.0  ;;  %v1560_v1 = vadd.f32 1.0, %v1559_v23 }
 0x141   : > { %v4139_v39 = vpop.eup %3291  ;;  %v4142_v57 = vadd.f32 %v3928_v35, %v1351_v17  ;;  %v1350_v47 = vadd.f32 %v1271_v9, %v4031_v13  ;;  %v1451_v38 = vmin.f32 %v4122_v12, 20.0  ;;  %3309 = vlog2.f32 %v1565_v4 }
 0x142   : > { %v3169_v48 = vpop.f32.mrf.mxu0  ;;  %v4147_v61 = vpop.eup %3293  ;;  %v1537_v19 = vsel %vm4124_vm5, %v1534_v62, %v1531_v16  ;;  %v1818_v8 = vsel %vm1402_vm3, %v3931_v40, %v1546_v43  ;;  %v1497_v2 = vmul.f32 1.442695, %v1449_v10  ;;  %v1552_v53 = vmul.f32 %v4053_v60, %v1551_v25 }
 0x143   : > { %v3296_v13 = vpop.eup %3295  ;;  %v1817_v5 = vsel %vm1401_vm4, %v3937_v31, %v1537_v19  ;;  %v1454_v17 = vmin.f32 %v4142_v57, 20.0  ;;  %v4163_v62 = vadd.f32 %v3928_v35, %v1350_v47  ;;  %v1353_v20 = vadd.f32 %v3169_v48, %v4036_v33  ;;  %v957_v48 = vpop.f32.mrf.mxu1 }
 0x144   : > { %v1281_v11 = vpop.f32.mrf.mxu0  ;;  %v4159_v6 = vpop.eup %3297  ;;  %3198 = vmatprep.mubr.msk.f32.mxu1 %vm1864_vm2, %v1817_v5  ;;  %v1549_v40 = vmul.f32 0.6931472, %v3296_v13  ;;  %3311 = vpow2.f32 %v1493_v15  ;;  %v1503_v26 = vmul.f32 1.442695, %v1452_v34  ;;  %v1562_v31 = vand.u32 2147483647, %v4073_v14 }
 0x145   : > { %v1352_v23 = vadd.f32 %v1281_v11, %v4045_v42  ;;  %3199 = vmatmul.mubr.msk.f32.vlgmr.msra.gmra.mxu1 %vm1864_vm2, %v1818_v8  ;;  %v4170_v60 = vpop.eup %3299  ;;  %3313 = vpow2.f32 %v1499_v18  ;;  %v1501_v43 = vmul.f32 1.442695, %v1451_v38  ;;  %v1561_v25 = vmul.f32 %v4073_v14, %v1560_v1  ;;  %v3125_v8 = vpop.f32.mrf.mxu1 }
 0x146   : > { %v3172_v9 = vpop.f32.mrf.mxu0  ;;  %v1555_v10 = vsel %vm4135_vm7, %v1552_v53, %v1549_v40  ;;  %v3302_v47 = vpop.eup %3301  ;;  %3315 = vpow2.f32 %v1497_v2  ;;  %v1568_v4 = vmul.f32 -0.5, %v4104_v28  ;;  %v1507_v15 = vmul.f32 1.442695, %v1454_v17 }
 0x147   : > { %v1355_v16 = vadd.f32 %v3172_v9, %v4048_v59  ;;  %v1819_v42 = vsel %vm1403_vm6, %v3950_v36, %v1555_v10  ;;  %v1453_v18 = vmin.f32 %v4163_v62, 20.0  ;;  %v4182_v29 = vadd.f32 %v3928_v35, %v1353_v20  ;;  %v4185_v38 = vpop.eup %3303 }
 0x148   : > { %v1291_v33 = vpop.f32.mrf.mxu0  ;;  %3201 = vmatprep.mubr.msk.f32.mxu1 %vm1864_vm2, %v1819_v42  ;;  %v1558_v14 = vmul.f32 0.6931472, %v3302_v47  ;;  %3317 = vpow2.f32 %v1503_v26  ;;  %v4188_v59 = vadd.f32 %v3928_v35, %v1352_v23  ;;  %vm1563_vm8 = vcmp.lt.f32.partialorder %v1562_v31, 0.0004427343 }
 0x149   : > { %v1354_v36 = vadd.f32 %v1291_v33, %v4057_v52  ;;  %3319 = vpow2.f32 %v1501_v43  ;;  %v1574_v1 = vadd.f32 1.0, %v4091_v3  ;;  %v4193_v13 = vpop.eup %3305  ;;  %v4196_v2 = vadd.f32 %v3928_v35, %v1355_v16  ;;  %v4883_v43 = vld [vmem:[#allocation3_spill] sm:$0xff]  ;;  %v4884_v33 = vld [vmem:[#allocation4_spill] sm:$0xff] }
 0x14a   : > { %v3175_v34 = vpop.f32.mrf.mxu0  ;;  %v1564_v19 = vsel %vm1563_vm8, %v1561_v25, %v1558_v14  ;;  %v1569_v17 = vadd.f32 1.0, %v1568_v4  ;;  %3321 = vpow2.f32 %v1507_v15  ;;  %v1505_v52 = vmul.f32 1.442695, %v1453_v18  ;;  %v967_v14 = vpop.f32.mrf.mxu1 }
 0x14b   : > { %v1820_v5 = vsel %vm1404_vm9, %v3945_v32, %v1564_v19  ;;  %v1357_v53 = vadd.f32 %v3175_v34, %v4064_v46  ;;  %v1456_v20 = vmin.f32 %v4182_v29, 20.0  ;;  %v1455_v26 = vmin.f32 %v4188_v59, 20.0  ;;  %v4209_v46 = vpop.eup %3307 }
 0x14c   : > { %v1301_v11 = vpop.f32.mrf.mxu0  ;;  %3202 = vmatmul.mubr.msk.f32.gmra.mxu1 %vm1864_vm2, %v1820_v5  ;;  %v4205_v23 = vadd.f32 %v3928_v35, %v1354_v36  ;;  %v1571_v31 = vand.u32 2147483647, %v4104_v28  ;;  %v958_v10 = vadd.f32 %v957_v48, %v4883_v43  ;;  %v973_v25 = vadd.f32 %v3125_v8, %v4884_v33 }
 0x14d   : > { %v1356_v9 = vadd.f32 %v1301_v11, %v4076_v24  ;;  %3323 = vlog2.f32 %v1574_v1  ;;  %v1458_v24 = vmin.f32 %v4196_v2, 20.0  ;;  %v4215_v16 = vadd.f32 %v3928_v35, %v1357_v53 }
 0x14e   : > { %v3178_v40 = vpop.f32.mrf.mxu0  ;;  %v3310_v47 = vpop.eup %3309  ;;  %v1570_v42 = vmul.f32 %v4104_v28, %v1569_v17  ;;  %v1583_v4 = vadd.f32 1.0, %v4130_v27  ;;  %3325 = vpow2.f32 %v1505_v52  ;;  %v1511_v15 = vmul.f32 1.442695, %v1456_v20 }
 0x14f   : > { %v1359_v32 = vadd.f32 %v3178_v40, %v4082_v56  ;;  %v1567_v56 = vmul.f32 0.6931472, %v3310_v47  ;;  %v4220_v18 = vadd.f32 %v3928_v35, %v1356_v9  ;;  %v1509_v34 = vmul.f32 1.442695, %v1455_v26  ;;  %v4885_v9 = vld [vmem:[#allocation5_spill] sm:$0xff] }
 0x150   : > { %v1311_v48 = vpop.f32.mrf.mxu0  ;;  %v1457_v36 = vmin.f32 %v4205_v23, 20.0  ;;  %vm1572_vm10 = vcmp.lt.f32.partialorder %v1571_v31, 0.0004427343  ;;  %v1577_v1 = vmul.f32 -0.5, %v4091_v3  ;;  %3327 = vlog2.f32 %v1583_v4 }
 0x151   : > { %v4224_v19 = vadd.f32 %v3928_v35, %v1359_v32  ;;  %v4226_v11 = vpop.eup %3311  ;;  %v1573_v28 = vsel %vm1572_vm10, %v1570_v42, %v1567_v56  ;;  %v1515_v5 = vmul.f32 1.442695, %v1458_v24  ;;  %v1460_v53 = vmin.f32 %v4215_v16, 20.0 }
 0x152   : > { %v4230_v8 = vpop.eup %3313  ;;  %v1821_v17 = vsel %vm1405_vm11, %v3964_v44, %v1573_v28  ;;  %v1358_v52 = vadd.f32 %v1311_v48, %v958_v10  ;;  %v968_v40 = vadd.f32 %v967_v14, %v4885_v9  ;;  %3329 = vpow2.f32 %v1511_v15  ;;  %v3181_v32 = vpop.f32.mrf.mxu0 }
 0x153   : > { %v4234_v20 = vpop.eup %3315  ;;  %3204 = vmatprep.mubr.msk.f32.mxu1 %vm1864_vm2, %v1821_v17  ;;  %v1459_v26 = vmin.f32 %v4220_v18, 20.0  ;;  %v1592_v31 = vadd.f32 1.0, %v4113_v0  ;;  %3331 = vpow2.f32 %v1509_v34  ;;  %v1513_v43 = vmul.f32 1.442695, %v1457_v36 }
 0x154   : > { %v1462_v33 = vmin.f32 %v4224_v19, 20.0  ;;  %v1586_v47 = vmul.f32 -0.5, %v4130_v27  ;;  %v1578_v10 = vadd.f32 1.0, %v1577_v1  ;;  %v1601_v24 = vadd.f32 1.0, %v4147_v61 }
 0x155   : > { %v4242_v44 = vpop.eup %3317  ;;  %3333 = vlog2.f32 %v1592_v31  ;;  %v1519_v4 = vmul.f32 1.442695, %v1460_v53  ;;  %v4249_v15 = vadd.f32 %v3928_v35, %v1358_v52  ;;  %v1361_v56 = vadd.f32 %v3181_v32, %v973_v25  ;;  %v1321_v25 = vpop.f32.mrf.mxu0 }
 0x156   : > { %v4246_v42 = vpop.eup %3319  ;;  %3335 = vpow2.f32 %v1515_v5  ;;  %v1517_v48 = vmul.f32 1.442695, %v1459_v26  ;;  %v1580_v14 = vand.u32 2147483647, %v4091_v3  ;;  %v1610_v34 = vadd.f32 1.0, %v4139_v39 }
 0x157   : > { %3337 = vlog2.f32 %v1601_v24  ;;  %v4253_v36 = vpop.eup %3321  ;;  %v1523_v28 = vmul.f32 1.442695, %v1462_v33  ;;  %v1587_v1 = vadd.f32 1.0, %v1586_v47  ;;  %v1589_v17 = vand.u32 2147483647, %v4130_v27 }
 0x158   : > { %3339 = vpow2.f32 %v1513_v43  ;;  %v1579_v5 = vmul.f32 %v4091_v3, %v1578_v10  ;;  %v1595_v53 = vmul.f32 -0.5, %v4113_v0  ;;  %v1461_v9 = vmin.f32 %v4249_v15, 20.0 }
 0x159   : > { %3341 = vlog2.f32 %v1610_v34  ;;  %v4261_v26 = vadd.f32 %v3928_v35, %v1361_v56  ;;  %v1619_v31 = vadd.f32 1.0, %v4170_v60  ;;  %vm1581_vm14 = vcmp.lt.f32.partialorder %v1580_v14, 0.0004427343 }
 0x15a   : > { %v3324_v52 = vpop.eup %3323  ;;  %3343 = vpow2.f32 %v1519_v4  ;;  %v1604_v3 = vmul.f32 -0.5, %v4147_v61  ;;  %v1588_v33 = vmul.f32 %v4130_v27, %v1587_v1  ;;  %vm4268_vm15 = vcmp.lt.f32.partialorder %v1589_v17, 0.0004427343 }
 0x15b   : > { %3345 = vpow2.f32 %v1517_v48  ;;  %v1576_v32 = vmul.f32 0.6931472, %v3324_v52  ;;  %v4265_v43 = vpop.eup %3325  ;;  %v1360_v10 = vadd.f32 %v1321_v25, %v968_v40  ;;  %v1596_v4 = vadd.f32 1.0, %v1595_v53 }
 0x15c   : > { %3347 = vpow2.f32 %v1523_v28  ;;  %v1598_v56 = vand.u32 2147483647, %v4113_v0  ;;  %v1521_v34 = vmul.f32 1.442695, %v1461_v9  ;;  %v1464_v27 = vmin.f32 %v4261_v26, 20.0 }
 0x15d   : > { %v1582_v24 = vsel %vm1581_vm14, %v1579_v5, %v1576_v32  ;;  %3349 = vlog2.f32 %v1619_v31  ;;  %v3328_v48 = vpop.eup %3327  ;;  %v1628_v28 = vadd.f32 1.0, %v4159_v6  ;;  %v1605_v1 = vadd.f32 1.0, %v1604_v3 }
 0x15e   : > { %v1822_v14 = vsel %vm1406_vm12, %v3959_v54, %v1582_v24  ;;  %v1585_v40 = vmul.f32 0.6931472, %v3328_v48  ;;  %v1607_v17 = vand.u32 2147483647, %v4147_v61  ;;  %v1613_v5 = vmul.f32 -0.5, %v4139_v39 }
 0x15f   : > { %3205 = vmatmul.mubr.msk.f32.gmra.mxu1 %vm1864_vm2, %v1822_v14  ;;  %v4282_v53 = vpop.eup %3329  ;;  %v4285_v25 = vadd.f32 %v3928_v35, %v1360_v10  ;;  %v1616_v54 = vand.u32 2147483647, %v4139_v39  ;;  %3351 = vlog2.f32 %v1628_v28  ;;  %v1637_v52 = vadd.f32 1.0, %v4193_v13 }
 0x160   : > { %v4289_v9 = vpop.eup %3331  ;;  %v1591_v31 = vsel %vm4268_vm15, %v1588_v33, %v1585_v40  ;;  %v1597_v32 = vmul.f32 %v4113_v0, %v1596_v4  ;;  %vm4294_vm1 = vcmp.lt.f32.partialorder %v1598_v56, 0.0004427343  ;;  %vm1409_vm3 = vcmp.gt.f32.partialorder %v4012_v7, 20.0 }
 0x161   : > { %vm1410_vm4 = vcmp.gt.f32.partialorder %v3989_v63, 20.0  ;;  %v1823_v10 = vsel %vm1407_vm13, %v3980_v37, %v1591_v31  ;;  %v1527_v24 = vmul.f32 1.442695, %v1464_v27  ;;  %v1622_v48 = vmul.f32 -0.5, %v4170_v60 }
 0x162   : > { %v3334_v35 = vpop.eup %3333  ;;  %3353 = vlog2.f32 %v1637_v52  ;;  %3207 = vmatprep.mubr.msk.f32.mxu1 %vm1864_vm2, %v1823_v10  ;;  %v1614_v47 = vadd.f32 1.0, %v1613_v5  ;;  %v1646_v4 = vadd.f32 1.0, %v4185_v38  ;;  %v1606_v14 = vmul.f32 %v4147_v61, %v1605_v1 }
 0x163   : > { %v4304_v33 = vpop.eup %3335  ;;  %3355 = vpow2.f32 %v1521_v34  ;;  %v1594_v0 = vmul.f32 0.6931472, %v3334_v35  ;;  %vm4309_vm5 = vcmp.lt.f32.partialorder %v1607_v17, 0.0004427343  ;;  %v1463_v37 = vmin.f32 %v4285_v25, 20.0 }
 0x164   : > { %v3338_v56 = vpop.eup %3337  ;;  %vm4314_vm6 = vcmp.lt.f32.partialorder %v1616_v54, 0.0004427343  ;;  %vm1411_vm7 = vcmp.gt.f32.partialorder %v4039_v45, 20.0  ;;  %v1631_v61 = vmul.f32 -0.5, %v4159_v6  ;;  %3357 = vlog2.f32 %v1646_v4 }
 0x165   : > { %v4318_v40 = vpop.eup %3339  ;;  %v1600_v34 = vsel %vm4294_vm1, %v1597_v32, %v1594_v0  ;;  %v1603_v5 = vmul.f32 0.6931472, %v3338_v56  ;;  %3359 = vpow2.f32 %v1527_v24  ;;  %v1623_v54 = vadd.f32 1.0, %v1622_v48 }
 0x166   : > { %v3342_v1 = vpop.eup %3341  ;;  %v1824_v17 = vsel %vm1408_vm0, %v3970_v50, %v1600_v34  ;;  %v1655_v52 = vadd.f32 1.0, %v4226_v11  ;;  %v1615_v35 = vmul.f32 %v4139_v39, %v1614_v47  ;;  %v1625_v10 = vand.u32 2147483647, %v4170_v60 }
 0x167   : > { %v4328_v31 = vpop.eup %3343  ;;  %3208 = vmatmul.mubr.msk.f32.gmra.mxu1 %vm1864_vm2, %v1824_v17  ;;  %v1609_v32 = vsel %vm4309_vm5, %v1606_v14, %v1603_v5  ;;  %v1612_v3 = vmul.f32 0.6931472, %v3342_v1  ;;  %vm1412_vm8 = vcmp.gt.f32.partialorder %v4027_v41, 20.0  ;;  %v1640_v24 = vmul.f32 -0.5, %v4193_v13 }
 0x168   : > { %v4335_v0 = vpop.eup %3345  ;;  %v1825_v50 = vsel %vm1409_vm3, %v4012_v7, %v1609_v32  ;;  %3361 = vlog2.f32 %v1655_v52  ;;  %v4345_v4 = vmul.f32 1.442695, %v1463_v37  ;;  %v1632_v47 = vadd.f32 1.0, %v1631_v61 }
 0x169   : > { %v4342_v48 = vpop.eup %3347  ;;  %3210 = vmatprep.mubr.msk.f32.mxu1 %vm1864_vm2, %v1825_v50  ;;  %v1618_v39 = vsel %vm4314_vm6, %v1615_v35, %v1612_v3  ;;  %v1664_v56 = vadd.f32 1.0, %v4209_v46  ;;  %v1624_v28 = vmul.f32 %v4170_v60, %v1623_v54  ;;  %v1634_v34 = vand.u32 2147483647, %v4159_v6 }
 0x16a   : > { %v3350_v14 = vpop.eup %3349  ;;  %v1826_v7 = vsel %vm1410_vm4, %v3989_v63, %v1618_v39  ;;  %v1649_v5 = vmul.f32 -0.5, %v4185_v38  ;;  %v1643_v27 = vand.u32 2147483647, %v4193_v13  ;;  %v1673_v61 = vadd.f32 1.0, %v4234_v20 }
 0x16b   : > { %3211 = vmatmul.mubr.msk.f32.gmra.mxu1 %vm1864_vm2, %v1826_v7  ;;  %v1621_v37 = vmul.f32 0.6931472, %v3350_v14  ;;  %3363 = vlog2.f32 %v1664_v56  ;;  %vm1626_vm9 = vcmp.lt.f32.partialorder %v1625_v10, 0.0004427343  ;;  %vm1413_vm10 = vcmp.gt.f32.partialorder %v4061_v21, 20.0 }
 0x16c   : > { %v1641_v1 = vadd.f32 1.0, %v1640_v24  ;;  %v1658_v63 = vmul.f32 -0.5, %v4226_v11  ;;  %v3352_v17 = vpop.eup %3351  ;;  %v1633_v54 = vmul.f32 %v4159_v6, %v1632_v47  ;;  %3365 = vlog2.f32 %v1673_v61 }
 0x16d   : > { %v1627_v60 = vsel %vm1626_vm9, %v1624_v28, %v1621_v37  ;;  %v1682_v52 = vadd.f32 1.0, %v4230_v8  ;;  %v1630_v3 = vmul.f32 0.6931472, %v3352_v17  ;;  %v1650_v35 = vadd.f32 1.0, %v1649_v5 }
 0x16e   : > { %v1827_v32 = vsel %vm1411_vm7, %v4039_v45, %v1627_v60  ;;  %v1652_v10 = vand.u32 2147483647, %v4185_v38  ;;  %vm1635_vm11 = vcmp.lt.f32.partialorder %v1634_v34, 0.0004427343  ;;  %vm4368_vm12 = vcmp.lt.f32.partialorder %v1643_v27, 0.0004427343 }
 0x16f   : > { %v3354_v50 = vpop.eup %3353  ;;  %3213 = vmatprep.mubr.msk.f32.mxu1 %vm1864_vm2, %v1827_v32  ;;  %vm1414_vm13 = vcmp.gt.f32.partialorder %v4051_v49, 20.0  ;;  %3367 = vlog2.f32 %v1682_v52  ;;  %v1636_v39 = vsel %vm1635_vm11, %v1633_v54, %v1630_v3  ;;  %v1642_v45 = vmul.f32 %v4193_v13, %v1641_v1 }
 0x170   : > { %v4373_v6 = vpop.eup %3355  ;;  %v1639_v47 = vmul.f32 0.6931472, %v3354_v50  ;;  %v1659_v56 = vadd.f32 1.0, %v1658_v63  ;;  %v1828_v14 = vsel %vm1412_vm8, %v4027_v41, %v1636_v39  ;;  %vm1415_vm14 = vcmp.gt.f32.partialorder %v4094_v51, 20.0 }
 0x171   : > { %v1667_v7 = vmul.f32 -0.5, %v4209_v46  ;;  %v1691_v28 = vadd.f32 1.0, %v4246_v42  ;;  %v3358_v34 = vpop.eup %3357  ;;  %3214 = vmatmul.mubr.msk.f32.gmra.mxu1 %vm1864_vm2, %v1828_v14  ;;  %v1651_v37 = vmul.f32 %v4185_v38, %v1650_v35  ;;  %vm4386_vm15 = vcmp.lt.f32.partialorder %v1652_v10, 0.0004427343 }
 0x172   : > { %v1645_v5 = vsel %vm4368_vm12, %v1642_v45, %v1639_v47  ;;  %v1661_v41 = vand.u32 2147483647, %v4226_v11  ;;  %v4391_v27 = vpop.eup %3359  ;;  %v1648_v1 = vmul.f32 0.6931472, %v3358_v34  ;;  %v1676_v63 = vmul.f32 -0.5, %v4234_v20 }
 0x173   : > { %v1829_v61 = vsel %vm1413_vm10, %v4061_v21, %v1645_v5  ;;  %3369 = vlog2.f32 %v1691_v28  ;;  %v1660_v38 = vmul.f32 %v4226_v11, %v1659_v56  ;;  %vm1416_vm0 = vcmp.gt.f32.partialorder %v4069_v22, 20.0 }
 0x174   : > { %3216 = vmatprep.mubr.msk.f32.mxu1 %vm1864_vm2, %v1829_v61  ;;  %v1670_v17 = vand.u32 2147483647, %v4209_v46  ;;  %v1700_v60 = vadd.f32 1.0, %v4242_v44  ;;  %v1654_v52 = vsel %vm4386_vm15, %v1651_v37, %v1648_v1  ;;  %v1668_v32 = vadd.f32 1.0, %v1667_v7 }
 0x175   : > { %v3362_v54 = vpop.eup %3361  ;;  %v1685_v21 = vmul.f32 -0.5, %v4230_v8  ;;  %v1709_v3 = vadd.f32 1.0, %v4265_v43  ;;  %v1830_v35 = vsel %vm1414_vm13, %v4051_v49, %v1654_v52  ;;  %v1679_v10 = vand.u32 2147483647, %v4234_v20 }
 0x176   : > { %v1657_v11 = vmul.f32 0.6931472, %v3362_v54  ;;  %3371 = vlog2.f32 %v1700_v60  ;;  %3217 = vmatmul.mubr.msk.f32.gmra.mxu1 %vm1864_vm2, %v1830_v35  ;;  %vm1662_vm1 = vcmp.lt.f32.partialorder %v1661_v41, 0.0004427343  ;;  %vm1417_vm3 = vcmp.gt.f32.partialorder %v4107_v30, 20.0 }
 0x177   : > { %v1677_v50 = vadd.f32 1.0, %v1676_v63  ;;  %3373 = vlog2.f32 %v1709_v3  ;;  %v1688_v47 = vand.u32 2147483647, %v4230_v8  ;;  %v1694_v45 = vmul.f32 -0.5, %v4246_v42 }
 0x178   : > { %v3364_v24 = vpop.eup %3363  ;;  %v1663_v39 = vsel %vm1662_vm1, %v1660_v38, %v1657_v11  ;;  %v1718_v56 = vadd.f32 1.0, %v4253_v36  ;;  %v1669_v7 = vmul.f32 %v4209_v46, %v1668_v32  ;;  %v1686_v28 = vadd.f32 1.0, %v1685_v21 }
 0x179   : > { %v1831_v49 = vsel %vm1415_vm14, %v4094_v51, %v1663_v39  ;;  %v1666_v14 = vmul.f32 0.6931472, %v3364_v24  ;;  %v3366_v34 = vpop.eup %3365  ;;  %vm1671_vm4 = vcmp.lt.f32.partialorder %v1670_v17, 0.0004427343  ;;  %vm4420_vm5 = vcmp.lt.f32.partialorder %v1679_v10, 0.0004427343 }
 0x17a   : > { %3219 = vmatprep.mubr.msk.f32.mxu1 %vm1864_vm2, %v1831_v49  ;;  %vm1418_vm6 = vcmp.gt.f32.partialorder %v4097_v58, 20.0  ;;  %3375 = vlog2.f32 %v1718_v56  ;;  %v1675_v13 = vmul.f32 0.6931472, %v3366_v34  ;;  %v1678_v41 = vmul.f32 %v4234_v20, %v1677_v50 }
 0x17b   : > { %v1672_v37 = vsel %vm1671_vm4, %v1669_v7, %v1666_v14  ;;  %v1703_v51 = vmul.f32 -0.5, %v4242_v44  ;;  %vm4430_vm7 = vcmp.lt.f32.partialorder %v1688_v47, 0.0004427343  ;;  %v1695_v63 = vadd.f32 1.0, %v1694_v45 }
 0x17c   : > { %v3368_v61 = vpop.eup %3367  ;;  %v1832_v46 = vsel %vm1416_vm0, %v4069_v22, %v1672_v37  ;;  %v1727_v38 = vadd.f32 1.0, %v4289_v9  ;;  %v1681_v17 = vsel %vm4420_vm5, %v1678_v41, %v1675_v13  ;;  %v1687_v60 = vmul.f32 %v4230_v8, %v1686_v28 }
 0x17d   : > { %3220 = vmatmul.mubr.msk.f32.gmra.mxu1 %vm1864_vm2, %v1832_v46  ;;  %v1684_v20 = vmul.f32 0.6931472, %v3368_v61  ;;  %v1712_v54 = vmul.f32 -0.5, %v4265_v43  ;;  %v1833_v22 = vsel %vm1417_vm3, %v4107_v30, %v1681_v17  ;;  %v1697_v52 = vand.u32 2147483647, %v4246_v42 }
 0x17e   : > { %v1706_v32 = vand.u32 2147483647, %v4242_v44  ;;  %3377 = vlog2.f32 %v1727_v38  ;;  %3222 = vmatprep.mubr.msk.f32.mxu1 %vm1864_vm2, %v1833_v22  ;;  %vm1419_vm8 = vcmp.gt.f32.partialorder %v4122_v12, 20.0  ;;  %v1704_v3 = vadd.f32 1.0, %v1703_v51 }
 0x17f   : > { %v1690_v21 = vsel %vm4430_vm7, %v1687_v60, %v1684_v20  ;;  %v1736_v8 = vadd.f32 1.0, %v4282_v53  ;;  %v1696_v11 = vmul.f32 %v4246_v42, %v1695_v63  ;;  %vm1420_vm9 = vcmp.gt.f32.partialorder %v4118_v55, 20.0 }
 0x180   : > { %v3370_v35 = vpop.eup %3369  ;;  %v1834_v30 = vsel %vm1418_vm6, %v4097_v58, %v1690_v21  ;;  %v1721_v10 = vmul.f32 -0.5, %v4253_v36  ;;  %v1713_v24 = vadd.f32 1.0, %v1712_v54  ;;  %v1745_v39 = vadd.f32 1.0, %v4318_v40 }
 0x181   : > { %3223 = vmatmul.mubr.msk.f32.gmra.mxu1 %vm1864_vm2, %v1834_v30  ;;  %v1693_v50 = vmul.f32 0.6931472, %v3370_v35  ;;  %3379 = vlog2.f32 %v1736_v8  ;;  %vm1698_vm10 = vcmp.lt.f32.partialorder %v1697_v52, 0.0004427343  ;;  %vm4459_vm11 = vcmp.lt.f32.partialorder %v1706_v32, 0.0004427343 }
 0x182   : > { %3381 = vpow2.f32 %v4345_v4  ;;  %v1715_v58 = vand.u32 2147483647, %v4265_v43  ;;  %v1705_v56 = vmul.f32 %v4242_v44, %v1704_v3  ;;  %v1754_v49 = vadd.f32 1.0, %v4304_v33 }
 0x183   : > { %v3372_v42 = vpop.eup %3371  ;;  %v1699_v45 = vsel %vm1698_vm10, %v1696_v11, %v1693_v50  ;;  %3383 = vlog2.f32 %v1745_v39  ;;  %v1722_v28 = vadd.f32 1.0, %v1721_v10  ;;  %v1730_v34 = vmul.f32 -0.5, %v4289_v9 }
 0x184   : > { %v3374_v14 = vpop.eup %3373  ;;  %v1835_v7 = vsel %vm1419_vm8, %v4122_v12, %v1699_v45  ;;  %v1702_v4 = vmul.f32 0.6931472, %v3372_v42  ;;  %v1714_v37 = vmul.f32 %v4265_v43, %v1713_v24  ;;  %v1724_v13 = vand.u32 2147483647, %v4253_v36 }
 0x185   : > { %3225 = vmatprep.mubr.msk.f32.mxu1 %vm1864_vm2, %v1835_v7  ;;  %v1711_v5 = vmul.f32 0.6931472, %v3374_v14  ;;  %3385 = vlog2.f32 %v1754_v49  ;;  %vm1421_vm12 = vcmp.gt.f32.partialorder %v4163_v62, 20.0  ;;  %vm1716_vm13 = vcmp.lt.f32.partialorder %v1715_v58, 0.0004427343 }
 0x186   : > { %v1708_v44 = vsel %vm4459_vm11, %v1705_v56, %v1702_v4  ;;  %v1739_v12 = vmul.f32 -0.5, %v4282_v53  ;;  %vm1422_vm14 = vcmp.gt.f32.partialorder %v4142_v57, 20.0  ;;  %v1763_v43 = vadd.f32 1.0, %v4335_v0 }
 0x187   : > { %v3376_v41 = vpop.eup %3375  ;;  %v1836_v51 = vsel %vm1420_vm9, %v4118_v55, %v1708_v44  ;;  %v1717_v61 = vsel %vm1716_vm13, %v1714_v37, %v1711_v5  ;;  %v1723_v63 = vmul.f32 %v4253_v36, %v1722_v28  ;;  %v1731_v38 = vadd.f32 1.0, %v1730_v34 }
 0x188   : > { %3226 = vmatmul.mubr.msk.f32.gmra.mxu1 %vm1864_vm2, %v1836_v51  ;;  %v1837_v46 = vsel %vm1421_vm12, %v4163_v62, %v1717_v61  ;;  %v1720_v1 = vmul.f32 0.6931472, %v3376_v41  ;;  %vm1725_vm15 = vcmp.lt.f32.partialorder %v1724_v13, 0.0004427343  ;;  %v1733_v17 = vand.u32 2147483647, %v4289_v9 }
 0x189   : > { %3228 = vmatprep.mubr.msk.f32.mxu1 %vm1864_vm2, %v1837_v46  ;;  %v1748_v55 = vmul.f32 -0.5, %v4318_v40  ;;  %3387 = vlog2.f32 %v1763_v43  ;;  %v1740_v60 = vadd.f32 1.0, %v1739_v12  ;;  %v1757_v54 = vmul.f32 -0.5, %v4304_v33 }
 0x18a   : > { %v1726_v20 = vsel %vm1725_vm15, %v1723_v63, %v1720_v1  ;;  %v1772_v22 = vadd.f32 1.0, %v4328_v31  ;;  %vm1423_vm0 = vcmp.gt.f32.partialorder %v4188_v59, 20.0  ;;  %vm1424_vm1 = vcmp.gt.f32.partialorder %v4182_v29, 20.0 }
 0x18b   : > { %v3378_v52 = vpop.eup %3377  ;;  %v1838_v62 = vsel %vm1422_vm14, %v4142_v57, %v1726_v20  ;;  %v1732_v32 = vmul.f32 %v4289_v9, %v1731_v38  ;;  %v1742_v21 = vand.u32 2147483647, %v4282_v53  ;;  %vm1734_vm3 = vcmp.lt.f32.partialorder %v1733_v17, 0.0004427343 }
 0x18c   : > { %3229 = vmatmul.mubr.msk.f32.gmra.mxu1 %vm1864_vm2, %v1838_v62  ;;  %v1729_v36 = vmul.f32 0.6931472, %v3378_v52  ;;  %3389 = vlog2.f32 %v1772_v22  ;;  %v1749_v3 = vadd.f32 1.0, %v1748_v55  ;;  %v1751_v8 = vand.u32 2147483647, %v4318_v40 }
 0x18d   : > { %v1781_v35 = vadd.f32 1.0, %v4373_v6  ;;  %v1741_v11 = vmul.f32 %v4282_v53, %v1740_v60  ;;  %v1758_v10 = vadd.f32 1.0, %v1757_v54  ;;  %v1790_v50 = vadd.f32 1.0, %v4342_v48 }
 0x18e   : > { %v3380_v30 = vpop.eup %3379  ;;  %v1735_v57 = vsel %vm1734_vm3, %v1732_v32, %v1729_v36  ;;  %v1766_v47 = vmul.f32 -0.5, %v4335_v0  ;;  %vm1743_vm4 = vcmp.lt.f32.partialorder %v1742_v21, 0.0004427343  ;;  %vm1425_vm5 = vcmp.gt.f32.partialorder %v4205_v23, 20.0 }
 0x18f   : > { %v4502_v24 = vpop.eup %3381  ;;  %v1839_v9 = vsel %vm1423_vm0, %v4188_v59, %v1735_v57  ;;  %v1738_v39 = vmul.f32 0.6931472, %v3380_v30  ;;  %3391 = vlog2.f32 %v1781_v35  ;;  %v1760_v53 = vand.u32 2147483647, %v4304_v33 }
 0x190   : > { %v3384_v58 = vpop.eup %3383  ;;  %3231 = vmatprep.mubr.msk.f32.mxu1 %vm1864_vm2, %v1839_v9  ;;  %3393 = vlog2.f32 %v1790_v50  ;;  %v1750_v56 = vmul.f32 %v4318_v40, %v1749_v3  ;;  %v1775_v49 = vmul.f32 -0.5, %v4328_v31  ;;  %vm1752_vm6 = vcmp.lt.f32.partialorder %v1751_v8, 0.0004427343 }
 0x191   : > { %v1744_v42 = vsel %vm1743_vm4, %v1741_v11, %v1738_v39  ;;  %v1747_v45 = vmul.f32 0.6931472, %v3384_v58  ;;  %vm1426_vm7 = vcmp.gt.f32.partialorder %v4196_v2, 20.0  ;;  %v1799_v7 = vadd.f32 1.0, %v4502_v24 }
 0x192   : > { %v3386_v59 = vpop.eup %3385  ;;  %v1840_v14 = vsel %vm1424_vm1, %v4182_v29, %v1744_v42  ;;  %v1759_v34 = vmul.f32 %v4304_v33, %v1758_v10  ;;  %v1767_v5 = vadd.f32 1.0, %v1766_v47  ;;  %vm1761_vm8 = vcmp.lt.f32.partialorder %v1760_v53, 0.0004427343  ;;  %v4566_v53 = vld [vmem:[%s4870_s4] ss:$0 sm:$0xff] }
 0x193   : > { %3232 = vmatmul.mubr.msk.f32.gmra.mxu1 %vm1864_vm2, %v1840_v14  ;;  %v1753_v4 = vsel %vm1752_vm6, %v1750_v56, %v1747_v45  ;;  %v1756_v28 = vmul.f32 0.6931472, %v3386_v59  ;;  %v1769_v37 = vand.u32 2147483647, %v4335_v0  ;;  %3395 = vlog2.f32 %v1799_v7 }
 0x194   : > { %v1841_v40 = vsel %vm1425_vm5, %v4205_v23, %v1753_v4  ;;  %v1776_v13 = vadd.f32 1.0, %v1775_v49  ;;  %v1784_v44 = vmul.f32 -0.5, %v4373_v6  ;;  %v1808_v12 = vadd.f32 1.0, %v4391_v27 }
 0x195   : > { %3234 = vmatprep.mubr.msk.f32.mxu1 %vm1864_vm2, %v1841_v40  ;;  %v1762_v29 = vsel %vm1761_vm8, %v1759_v34, %v1756_v28  ;;  %v1793_v51 = vmul.f32 -0.5, %v4342_v48  ;;  %v1768_v61 = vmul.f32 %v4335_v0, %v1767_v5  ;;  %v1778_v43 = vand.u32 2147483647, %v4328_v31 }
 0x196   : > { %v3388_v41 = vpop.eup %3387  ;;  %v1842_v33 = vsel %vm1426_vm7, %v4196_v2, %v1762_v29  ;;  %3397 = vlog2.f32 %v1808_v12  ;;  %vm1427_vm9 = vcmp.gt.f32.partialorder %v4220_v18, 20.0  ;;  %vm1770_vm10 = vcmp.lt.f32.partialorder %v1769_v37, 0.0004427343 }
 0x197   : > { %3235 = vmatmul.mubr.msk.f32.gmra.mxu1 %vm1864_vm2, %v1842_v33  ;;  %v1765_v23 = vmul.f32 0.6931472, %v3388_v41  ;;  %v1777_v63 = vmul.f32 %v4328_v31, %v1776_v13  ;;  %v1785_v38 = vadd.f32 1.0, %v1784_v44  ;;  %v1787_v2 = vand.u32 2147483647, %v4373_v6 }
 0x198   : > { %v1794_v20 = vadd.f32 1.0, %v1793_v51  ;;  %v1802_v60 = vmul.f32 -0.5, %v4502_v24  ;;  %vm1779_vm11 = vcmp.lt.f32.partialorder %v1778_v43, 0.0004427343  ;;  %v1796_v0 = vand.u32 2147483647, %v4342_v48 }
 0x199   : > { %v3390_v46 = vpop.eup %3389  ;;  %v1771_v1 = vsel %vm1770_vm10, %v1768_v61, %v1765_v23  ;;  %vm1428_vm12 = vcmp.gt.f32.partialorder %v4215_v16, 20.0  ;;  %v1786_v36 = vmul.f32 %v4373_v6, %v1785_v38  ;;  %vm1788_vm13 = vcmp.lt.f32.partialorder %v1787_v2, 0.0004427343 }
 0x19a   : > { %v1843_v17 = vsel %vm1427_vm9, %v4220_v18, %v1771_v1  ;;  %v1774_v55 = vmul.f32 0.6931472, %v3390_v46  ;;  %v1811_v18 = vmul.f32 -0.5, %v4391_v27  ;;  %v1795_v21 = vmul.f32 %v4342_v48, %v1794_v20 }
 0x19b   : > { %3237 = vmatprep.mubr.msk.f32.mxu1 %vm1864_vm2, %v1843_v17  ;;  %v1803_v3 = vadd.f32 1.0, %v1802_v60  ;;  %vm1429_vm14 = vcmp.gt.f32.partialorder %v4249_v15, 20.0  ;;  %vm1797_vm15 = vcmp.lt.f32.partialorder %v1796_v0, 0.0004427343  ;;  %v1805_v35 = vand.u32 2147483647, %v4502_v24 }
 0x19c   : > { %v3392_v54 = vpop.eup %3391  ;;  %v1780_v22 = vsel %vm1779_vm11, %v1777_v63, %v1774_v55  ;;  %vm1430_vm0 = vcmp.gt.f32.partialorder %v4224_v19, 20.0  ;;  %v1812_v11 = vadd.f32 1.0, %v1811_v18  ;;  %v1814_v50 = vand.u32 2147483647, %v4391_v27 }
 0x19d   : > { %v3394_v52 = vpop.eup %3393  ;;  %v1844_v31 = vsel %vm1428_vm12, %v4215_v16, %v1780_v22  ;;  %v1783_v62 = vmul.f32 0.6931472, %v3392_v54  ;;  %v1804_v10 = vmul.f32 %v4502_v24, %v1803_v3  ;;  %vm1806_vm1 = vcmp.lt.f32.partialorder %v1805_v35, 0.0004427343 }
 0x19e   : > { %3238 = vmatmul.mubr.msk.f32.gmra.mxu1 %vm1864_vm2, %v1844_v31  ;;  %v1792_v32 = vmul.f32 0.6931472, %v3394_v52  ;;  %vm1431_vm3 = vcmp.gt.f32.partialorder %v4285_v25, 20.0  ;;  %v1813_v58 = vmul.f32 %v4391_v27, %v1812_v11  ;;  %vm1815_vm4 = vcmp.lt.f32.partialorder %v1814_v50, 0.0004427343 }
 0x19f   : > { %v1789_v8 = vsel %vm1788_vm13, %v1786_v36, %v1783_v62  ;;  %vm1432_vm5 = vcmp.gt.f32.partialorder %v4261_v26, 20.0  ;;  %v2442_v41 = vlaneseq  ;;  %vm2477_vm6 = vcmask 269312  }
 0x1a0   : > { %v1845_v16 = vsel %vm1429_vm14, %v4249_v15, %v1789_v8  ;;  %v1798_v6 = vsel %vm1797_vm15, %v1795_v21, %v1792_v32  ;;  %v3396_v30 = vpop.eup %3395 }
 0x1a1   : > { %3240 = vmatprep.mubr.msk.f32.mxu1 %vm1864_vm2, %v1845_v16  ;;  %v1846_v57 = vsel %vm1430_vm0, %v4224_v19, %v1798_v6  ;;  %v1801_v48 = vmul.f32 0.6931472, %v3396_v30  ;;  %v4585_v46 = vand.u32 127, %v2442_v41 }
 0x1a2   : > { %3241 = vmatmul.mubr.msk.f32.gmra.mxu1 %vm1864_vm2, %v1846_v57 }
 0x1a3   : > { %v3398_v9 = vpop.eup %3397  ;;  %v1807_v15 = vsel %vm1806_vm1, %v1804_v10, %v1801_v48 }
 0x1a4   : > { %v1847_v39 = vsel %vm1431_vm3, %v4285_v25, %v1807_v15  ;;  %v1810_v47 = vmul.f32 0.6931472, %v3398_v9 }
 0x1a5   : > { %3243 = vmatprep.mubr.msk.f32.mxu1 %vm1864_vm2, %v1847_v39 }
 0x1a6   : > { %v1816_v19 = vsel %vm1815_vm4, %v1813_v58, %v1810_v47 }
 0x1a7   : > { %v1848_v24 = vsel %vm1432_vm5, %v4261_v26, %v1816_v19 }
 0x1a8   : > { %3244 = vmatmul.mubr.msk.f32.gmra.mxu1 %vm1864_vm2, %v1848_v24  ;;  %vm2444_vm2 = vcmp.eq.s32.totalorder %v4585_v46, 0 }
 0x205   : > { %v3200_v42 = vpop.f32.mrf.mxu1 }
 0x206   : > { %v2033_v25 = vadd.f32 %v3200_v42, %v4566_v53 }
 0x207   : > { %v2027_v45 = vpop.f32.mrf.mxu1 }
 0x208   : > { %v2800_v27 = vmul.f32 -1.442695, %v2033_v25  ;;  %v2028_v56 = vadd.f32 %v4566_v53, %v2027_v45 }
 0x20a   : > { %3399 = vpow2.f32 %v2800_v27  ;;  %v2799_v49 = vmul.f32 -1.442695, %v2028_v56 }
 0x20c   : > { %3401 = vpow2.f32 %v2799_v49  ;;  %v3203_v59 = vpop.f32.mrf.mxu1 }
 0x20d   : > { %v4571_v26 = vadd.f32 %v3203_v59, %v4566_v53 }
 0x20e   : > { %v2037_v14 = vpop.f32.mrf.mxu1 }
 0x20f   : > { %v2802_v7 = vmul.f32 -1.442695, %v4571_v26  ;;  %v4575_v4 = vadd.f32 %v4566_v53, %v2037_v14 }
 0x211   : > { %3403 = vpow2.f32 %v2802_v7  ;;  %v2801_v28 = vmul.f32 -1.442695, %v4575_v4 }
 0x213   : > { %3405 = vpow2.f32 %v2801_v28 }
 0x217   : > { %v3400_v34 = vpop.eup %3399 }
 0x218   : > { %v2283_v5 = vadd.f32 1.0, %v3400_v34 }
 0x219   : > { %v3402_v40 = vpop.eup %3401 }
 0x21a   : > { %3407 = vrcp.f32 %v2283_v5  ;;  %v2282_v37 = vadd.f32 1.0, %v3402_v40 }
 0x21c   : > { %3409 = vrcp.f32 %v2282_v37 }
 0x21e   : > { %v3404_v29 = vpop.eup %3403 }
 0x21f   : > { %v2285_v13 = vadd.f32 1.0, %v3404_v29  ;;  %v3206_v12 = vpop.f32.mrf.mxu1 }
 0x220   : > { %v3406_v44 = vpop.eup %3405  ;;  %v4579_v51 = vadd.f32 %v3206_v12, %v4566_v53 }
 0x221   : > { %3411 = vrcp.f32 %v2285_v13  ;;  %v2284_v33 = vadd.f32 1.0, %v3406_v44  ;;  %v2047_v23 = vpop.f32.mrf.mxu1 }
 0x222   : > { %v2804_v61 = vmul.f32 -1.442695, %v4579_v51  ;;  %v4583_v43 = vadd.f32 %v4566_v53, %v2047_v23 }
 0x223   : > { %3413 = vrcp.f32 %v2284_v33 }
 0x224   : > { %3415 = vpow2.f32 %v2804_v61  ;;  %v2803_v1 = vmul.f32 -1.442695, %v4583_v43 }
 0x226   : > { %3417 = vpow2.f32 %v2803_v1 }
 0x227   : > { %v3408_v63 = vpop.eup %3407  ;;  %v3209_v2 = vpop.f32.mrf.mxu1 }
 0x228   : > { %v2379_v38 = vmul.f32 1.002, %v3408_v63  ;;  %v4591_v55 = vadd.f32 %v3209_v2, %v4566_v53 }
 0x229   : > { %v3410_v17 = vpop.eup %3409  ;;  %v2057_v0 = vpop.f32.mrf.mxu1 }
 0x22a   : > { %v2832_v20 = vadd.f32 -0.001, %v2379_v38  ;;  %v2378_v60 = vmul.f32 1.002, %v3410_v17  ;;  %v2806_v54 = vmul.f32 -1.442695, %v4591_v55  ;;  %v4600_v22 = vadd.f32 %v4566_v53, %v2057_v0 }
 0x22b   : > { %v3212_v62 = vpop.f32.mrf.mxu1 }
 0x22c   : > { %v2446_v52 = vsel %vm2444_vm2, %v2033_v25, %v2832_v20  ;;  %v2831_v31 = vadd.f32 -0.001, %v2378_v60  ;;  %3419 = vpow2.f32 %v2806_v54  ;;  %v2805_v36 = vmul.f32 -1.442695, %v4600_v22 }
 0x22d   : > { %2479 = vst.msk [vmem:[%s4596_s11 + $0x8] sm:$0xff] %vm2477_vm6, %v2446_v52  ;;  %v4608_v18 = vadd.f32 %v3212_v62, %v4566_v53  ;;  %v2067_v3 = vpop.f32.mrf.mxu1 }
 0x22e   : > { %v3412_v32 = vpop.eup %3411  ;;  %v2445_v21 = vsel %vm2444_vm2, %v2028_v56, %v2831_v31  ;;  %3421 = vpow2.f32 %v2805_v36  ;;  %v4616_v16 = vadd.f32 %v4566_v53, %v2067_v3 }
 0x22f   : > { %2478 = vst.msk [vmem:[%s4596_s11] sm:$0xff] %vm2477_vm6, %v2445_v21  ;;  %v2381_v8 = vmul.f32 1.002, %v3412_v32  ;;  %v2808_v35 = vmul.f32 -1.442695, %v4608_v18 }
 0x230   : > { %v3414_v6 = vpop.eup %3413  ;;  %v2807_v11 = vmul.f32 -1.442695, %v4616_v16 }
 0x231   : > { %v2834_v30 = vadd.f32 -0.001, %v2381_v8  ;;  %v2380_v57 = vmul.f32 1.002, %v3414_v6  ;;  %3423 = vpow2.f32 %v2808_v35  ;;  %v3416_v48 = vpop.eup %3415  ;;  %v3215_v15 = vpop.f32.mrf.mxu1 }
 0x232   : > { %v2287_v9 = vadd.f32 1.0, %v3416_v48  ;;  %3425 = vpow2.f32 %v2807_v11  ;;  %v4625_v47 = vadd.f32 %v3215_v15, %v4566_v53 }
 0x233   : > { %v2448_v10 = vsel %vm2444_vm2, %v4571_v26, %v2834_v30  ;;  %v2833_v50 = vadd.f32 -0.001, %v2380_v57  ;;  %v3418_v39 = vpop.eup %3417  ;;  %v2077_v24 = vpop.f32.mrf.mxu1 }
 0x234   : > { %2481 = vst.msk [vmem:[%s4596_s11 + $0x18] sm:$0xff] %vm2477_vm6, %v2448_v10  ;;  %3427 = vrcp.f32 %v2287_v9  ;;  %v2286_v19 = vadd.f32 1.0, %v3418_v39  ;;  %v2810_v42 = vmul.f32 -1.442695, %v4625_v47  ;;  %v4634_v25 = vadd.f32 %v4566_v53, %v2077_v24 }
 0x235   : > { %v2447_v58 = vsel %vm2444_vm2, %v4575_v4, %v2833_v50 }
 0x236   : > { %2480 = vst.msk [vmem:[%s4596_s11 + $0x10] sm:$0xff] %vm2477_vm6, %v2447_v58  ;;  %3429 = vrcp.f32 %v2286_v19  ;;  %v2809_v45 = vmul.f32 -1.442695, %v4634_v25  ;;  %v3218_v27 = vpop.f32.mrf.mxu1 }
 0x237   : > { %3431 = vpow2.f32 %v2810_v42  ;;  %v4638_v56 = vadd.f32 %v3218_v27, %v4566_v53 }
 0x238   : > { %3433 = vpow2.f32 %v2809_v45  ;;  %v2087_v59 = vpop.f32.mrf.mxu1 }
 0x239   : > { %v3420_v49 = vpop.eup %3419  ;;  %v2812_v14 = vmul.f32 -1.442695, %v4638_v56  ;;  %v4642_v7 = vadd.f32 %v4566_v53, %v2087_v59 }
 0x23a   : > { %v2289_v26 = vadd.f32 1.0, %v3420_v49 }
 0x23b   : > { %v3422_v4 = vpop.eup %3421  ;;  %v2811_v34 = vmul.f32 -1.442695, %v4642_v7 }
 0x23c   : > { %3435 = vrcp.f32 %v2289_v26  ;;  %v2288_v28 = vadd.f32 1.0, %v3422_v4 }
 0x23d   : > { %3437 = vpow2.f32 %v2812_v14  ;;  %v3221_v40 = vpop.f32.mrf.mxu1 }
 0x23e   : > { %v3424_v5 = vpop.eup %3423  ;;  %3439 = vrcp.f32 %v2288_v28  ;;  %v4646_v29 = vadd.f32 %v3221_v40, %v4566_v53 }
 0x23f   : > { %v2291_v37 = vadd.f32 1.0, %v3424_v5  ;;  %v3426_v13 = vpop.eup %3425  ;;  %3441 = vpow2.f32 %v2811_v34  ;;  %v2097_v44 = vpop.f32.mrf.mxu1 }
 0x240   : > { %v2290_v12 = vadd.f32 1.0, %v3426_v13  ;;  %v2814_v41 = vmul.f32 -1.442695, %v4646_v29  ;;  %v4650_v33 = vadd.f32 %v4566_v53, %v2097_v44 }
 0x241   : > { %3443 = vrcp.f32 %v2291_v37  ;;  %v3428_v23 = vpop.eup %3427  ;;  %v3224_v61 = vpop.f32.mrf.mxu1 }
 0x242   : > { %v2383_v1 = vmul.f32 1.002, %v3428_v23  ;;  %3445 = vrcp.f32 %v2290_v12  ;;  %v2813_v63 = vmul.f32 -1.442695, %v4650_v33  ;;  %v4654_v38 = vadd.f32 %v3224_v61, %v4566_v53 }
 0x243   : > { %v3430_v2 = vpop.eup %3429  ;;  %3447 = vpow2.f32 %v2814_v41  ;;  %v2107_v17 = vpop.f32.mrf.mxu1 }
 0x244   : > { %v3432_v20 = vpop.eup %3431  ;;  %v2836_v60 = vadd.f32 -0.001, %v2383_v1  ;;  %v2382_v0 = vmul.f32 1.002, %v3430_v2  ;;  %3449 = vpow2.f32 %v2813_v63  ;;  %v2816_v54 = vmul.f32 -1.442695, %v4654_v38 }
 0x245   : > { %v2293_v52 = vadd.f32 1.0, %v3432_v20  ;;  %v4658_v31 = vadd.f32 %v4566_v53, %v2107_v17  ;;  %v3434_v62 = vpop.eup %3433 }
 0x246   : > { %v2450_v36 = vsel %vm2444_vm2, %v4579_v51, %v2836_v60  ;;  %v2835_v32 = vadd.f32 -0.001, %v2382_v0  ;;  %3451 = vpow2.f32 %v2816_v54  ;;  %v2292_v21 = vadd.f32 1.0, %v3434_v62 }
 0x247   : > { %2483 = vst.msk [vmem:[%s4596_s11 + $0x28] sm:$0xff] %vm2477_vm6, %v2450_v36  ;;  %3453 = vrcp.f32 %v2293_v52  ;;  %v2815_v3 = vmul.f32 -1.442695, %v4658_v31 }
 0x248   : > { %v2449_v8 = vsel %vm2444_vm2, %v4583_v43, %v2835_v32  ;;  %v3227_v35 = vpop.f32.mrf.mxu1  ;;  %3455 = vrcp.f32 %v2292_v21 }
 0x249   : > { %v3436_v6 = vpop.eup %3435  ;;  %2482 = vst.msk [vmem:[%s4596_s11 + $0x20] sm:$0xff] %vm2477_vm6, %v2449_v8  ;;  %v4672_v30 = vadd.f32 %v3227_v35, %v4566_v53  ;;  %3457 = vpow2.f32 %v2815_v3 }
 0x24a   : > { %v3438_v51 = vpop.eup %3437  ;;  %v2385_v57 = vmul.f32 1.002, %v3436_v6  ;;  %v2117_v11 = vpop.f32.mrf.mxu1 }
 0x24b   : > { %v3440_v48 = vpop.eup %3439  ;;  %v2295_v10 = vadd.f32 1.0, %v3438_v51  ;;  %v2818_v50 = vmul.f32 -1.442695, %v4672_v30  ;;  %v4676_v9 = vadd.f32 %v4566_v53, %v2117_v11 }
 0x24c   : > { %v3442_v43 = vpop.eup %3441  ;;  %v2838_v15 = vadd.f32 -0.001, %v2385_v57  ;;  %v2384_v39 = vmul.f32 1.002, %v3440_v48  ;;  %v3230_v58 = vpop.f32.mrf.mxu1 }
 0x24d   : > { %3459 = vrcp.f32 %v2295_v10  ;;  %v2294_v24 = vadd.f32 1.0, %v3442_v43  ;;  %v2817_v42 = vmul.f32 -1.442695, %v4676_v9  ;;  %v4680_v45 = vadd.f32 %v3230_v58, %v4566_v53 }
 0x24e   : > { %v3444_v19 = vpop.eup %3443  ;;  %v2452_v27 = vsel %vm2444_vm2, %v4591_v55, %v2838_v15  ;;  %v2837_v49 = vadd.f32 -0.001, %v2384_v39  ;;  %3461 = vpow2.f32 %v2818_v50  ;;  %v2127_v26 = vpop.f32.mrf.mxu1 }
 0x24f   : > { %v2387_v59 = vmul.f32 1.002, %v3444_v19  ;;  %v3446_v14 = vpop.eup %3445  ;;  %2485 = vst.msk [vmem:[%s4596_s11 + $0x38] sm:$0xff] %vm2477_vm6, %v2452_v27  ;;  %3463 = vrcp.f32 %v2294_v24  ;;  %v2820_v4 = vmul.f32 -1.442695, %v4680_v45  ;;  %v4689_v28 = vadd.f32 %v4566_v53, %v2127_v26 }
 0x250   : > { %v3448_v34 = vpop.eup %3447  ;;  %v2451_v55 = vsel %vm2444_vm2, %v4600_v22, %v2837_v49  ;;  %v2386_v40 = vmul.f32 1.002, %v3446_v14  ;;  %3465 = vpow2.f32 %v2817_v42 }
 0x251   : > { %v2840_v5 = vadd.f32 -0.001, %v2387_v59  ;;  %v3450_v37 = vpop.eup %3449  ;;  %2484 = vst.msk [vmem:[%s4596_s11 + $0x30] sm:$0xff] %vm2477_vm6, %v2451_v55  ;;  %v2297_v13 = vadd.f32 1.0, %v3448_v34  ;;  %3467 = vpow2.f32 %v2820_v4  ;;  %v2819_v44 = vmul.f32 -1.442695, %v4689_v28 }
 0x252   : > { %v2839_v41 = vadd.f32 -0.001, %v2386_v40  ;;  %v2296_v23 = vadd.f32 1.0, %v3450_v37 }
 0x253   : > { %v2454_v12 = vsel %vm2444_vm2, %v4608_v18, %v2840_v5  ;;  %v3452_v61 = vpop.eup %3451  ;;  %3469 = vrcp.f32 %v2297_v13  ;;  %v3233_v22 = vpop.f32.mrf.mxu1 }
 0x254   : > { %2487 = vst.msk [vmem:[%s4596_s11 + $0x48] sm:$0xff] %vm2477_vm6, %v2454_v12  ;;  %v3454_v1 = vpop.eup %3453  ;;  %v2453_v63 = vsel %vm2444_vm2, %v4616_v16, %v2839_v41  ;;  %3471 = vrcp.f32 %v2296_v23  ;;  %v2299_v2 = vadd.f32 1.0, %v3452_v61  ;;  %v4706_v17 = vadd.f32 %v3233_v22, %v4566_v53 }
 0x255   : > { %2486 = vst.msk [vmem:[%s4596_s11 + $0x40] sm:$0xff] %vm2477_vm6, %v2453_v63  ;;  %v2389_v18 = vmul.f32 1.002, %v3454_v1  ;;  %3473 = vpow2.f32 %v2819_v44  ;;  %v2137_v20 = vpop.f32.mrf.mxu1  ;;  %v3456_v60 = vpop.eup %3455 }
 0x256   : > { %3475 = vrcp.f32 %v2299_v2  ;;  %v2822_v0 = vmul.f32 -1.442695, %v4706_v17  ;;  %v4712_v54 = vadd.f32 %v4566_v53, %v2137_v20  ;;  %v3458_v52 = vpop.eup %3457  ;;  %v2388_v62 = vmul.f32 1.002, %v3456_v60 }
 0x257   : > { %v2842_v16 = vadd.f32 -0.001, %v2389_v18  ;;  %v3236_v36 = vpop.f32.mrf.mxu1  ;;  %v2298_v32 = vadd.f32 1.0, %v3458_v52 }
 0x258   : > { %3477 = vpow2.f32 %v2822_v0  ;;  %v2821_v21 = vmul.f32 -1.442695, %v4712_v54  ;;  %v4716_v3 = vadd.f32 %v3236_v36, %v4566_v53  ;;  %v2841_v35 = vadd.f32 -0.001, %v2388_v62 }
 0x259   : > { %v2456_v8 = vsel %vm2444_vm2, %v4625_v47, %v2842_v16  ;;  %v2147_v6 = vpop.f32.mrf.mxu1  ;;  %3479 = vrcp.f32 %v2298_v32 }
 0x25a   : > { %v3460_v51 = vpop.eup %3459  ;;  %2489 = vst.msk [vmem:[%s4596_s11 + $0x58] sm:$0xff] %vm2477_vm6, %v2456_v8  ;;  %v2824_v57 = vmul.f32 -1.442695, %v4716_v3  ;;  %v4725_v11 = vadd.f32 %v4566_v53, %v2147_v6  ;;  %v2455_v10 = vsel %vm2444_vm2, %v4634_v25, %v2841_v35  ;;  %3481 = vpow2.f32 %v2821_v21 }
 0x25b   : > { %v3462_v48 = vpop.eup %3461  ;;  %v2391_v50 = vmul.f32 1.002, %v3460_v51  ;;  %2488 = vst.msk [vmem:[%s4596_s11 + $0x50] sm:$0xff] %vm2477_vm6, %v2455_v10 }
 0x25c   : > { %v3464_v43 = vpop.eup %3463  ;;  %v2301_v47 = vadd.f32 1.0, %v3462_v48  ;;  %3483 = vpow2.f32 %v2824_v57  ;;  %v2823_v15 = vmul.f32 -1.442695, %v4725_v11 }
 0x25d   : > { %v3466_v39 = vpop.eup %3465  ;;  %v2844_v58 = vadd.f32 -0.001, %v2391_v50  ;;  %v2390_v19 = vmul.f32 1.002, %v3464_v43 }
 0x25e   : > { %v3468_v24 = vpop.eup %3467  ;;  %3485 = vrcp.f32 %v2301_v47  ;;  %v2300_v42 = vadd.f32 1.0, %v3466_v39  ;;  %v3239_v27 = vpop.f32.mrf.mxu1 }
 0x25f   : > { %v2458_v25 = vsel %vm2444_vm2, %v4638_v56, %v2844_v58  ;;  %v2843_v49 = vadd.f32 -0.001, %v2390_v19  ;;  %v2303_v59 = vadd.f32 1.0, %v3468_v24  ;;  %3487 = vpow2.f32 %v2823_v15 }
 0x260   : > { %v3470_v26 = vpop.eup %3469  ;;  %2491 = vst.msk [vmem:[%s4596_s11 + $0x68] sm:$0xff] %vm2477_vm6, %v2458_v25  ;;  %3489 = vrcp.f32 %v2300_v42  ;;  %v4739_v14 = vadd.f32 %v3239_v27, %v4566_v53  ;;  %v2157_v4 = vpop.f32.mrf.mxu1 }
 0x261   : > { %v3472_v34 = vpop.eup %3471  ;;  %v2457_v55 = vsel %vm2444_vm2, %v4642_v7, %v2843_v49  ;;  %v2393_v5 = vmul.f32 1.002, %v3470_v26  ;;  %3491 = vrcp.f32 %v2303_v59  ;;  %v4745_v56 = vadd.f32 %v4566_v53, %v2157_v4 }
 0x262   : > { %v3474_v40 = vpop.eup %3473  ;;  %2490 = vst.msk [vmem:[%s4596_s11 + $0x60] sm:$0xff] %vm2477_vm6, %v2457_v55  ;;  %v2392_v37 = vmul.f32 1.002, %v3472_v34  ;;  %v2826_v13 = vmul.f32 -1.442695, %v4739_v14  ;;  %v3242_v44 = vpop.f32.mrf.mxu1 }
 0x263   : > { %v3476_v12 = vpop.eup %3475  ;;  %v2846_v41 = vadd.f32 -0.001, %v2393_v5  ;;  %v2302_v23 = vadd.f32 1.0, %v3474_v40  ;;  %v2825_v61 = vmul.f32 -1.442695, %v4745_v56  ;;  %v4752_v7 = vadd.f32 %v3242_v44, %v4566_v53 }
 0x264   : > { %v2845_v22 = vadd.f32 -0.001, %v2392_v37  ;;  %v2395_v1 = vmul.f32 1.002, %v3476_v12  ;;  %3493 = vpow2.f32 %v2826_v13  ;;  %v2167_v63 = vpop.f32.mrf.mxu1 }
 0x265   : > { %v3478_v2 = vpop.eup %3477  ;;  %v2460_v18 = vsel %vm2444_vm2, %v4646_v29, %v2846_v41  ;;  %3495 = vrcp.f32 %v2302_v23  ;;  %v2828_v20 = vmul.f32 -1.442695, %v4752_v7  ;;  %v4759_v60 = vadd.f32 %v4566_v53, %v2167_v63 }
 0x266   : > { %2493 = vst.msk [vmem:[%s4596_s11 + $0x78] sm:$0xff] %vm2477_vm6, %v2460_v18  ;;  %v2459_v0 = vsel %vm2444_vm2, %v4650_v33, %v2845_v22  ;;  %v2848_v52 = vadd.f32 -0.001, %v2395_v1  ;;  %v2305_v16 = vadd.f32 1.0, %v3478_v2  ;;  %3497 = vpow2.f32 %v2825_v61  ;;  %v3480_v62 = vpop.eup %3479 }
 0x267   : > { %2492 = vst.msk [vmem:[%s4596_s11 + $0x70] sm:$0xff] %vm2477_vm6, %v2459_v0  ;;  %3499 = vpow2.f32 %v2828_v20  ;;  %v2827_v29 = vmul.f32 -1.442695, %v4759_v60  ;;  %v3482_v36 = vpop.eup %3481  ;;  %v2394_v21 = vmul.f32 1.002, %v3480_v62 }
 0x268   : > { %v2462_v32 = vsel %vm2444_vm2, %v4654_v38, %v2848_v52  ;;  %3501 = vrcp.f32 %v2305_v16  ;;  %v2304_v33 = vadd.f32 1.0, %v3482_v36  ;;  %v3245_v35 = vpop.f32.mrf.mxu1 }
 0x269   : > { %v3484_v8 = vpop.eup %3483  ;;  %2495 = vst.msk [vmem:[%s4596_s11 + $0x88] sm:$0xff] %vm2477_vm6, %v2462_v32  ;;  %3503 = vpow2.f32 %v2827_v29  ;;  %v2847_v6 = vadd.f32 -0.001, %v2394_v21  ;;  %v4775_v57 = vadd.f32 %v3245_v35, %v4566_v53 }
 0x26a   : > { %v2307_v51 = vadd.f32 1.0, %v3484_v8  ;;  %3505 = vrcp.f32 %v2304_v33  ;;  %v2177_v10 = vpop.f32.mrf.mxu1 }
 0x26b   : > { %v3486_v48 = vpop.eup %3485  ;;  %v2461_v38 = vsel %vm2444_vm2, %v4658_v31, %v2847_v6  ;;  %v2830_v47 = vmul.f32 -1.442695, %v4775_v57  ;;  %v4784_v58 = vadd.f32 %v4566_v53, %v2177_v10 }
 0x26c   : > { %v3488_v50 = vpop.eup %3487  ;;  %v2397_v43 = vmul.f32 1.002, %v3486_v48  ;;  %3507 = vrcp.f32 %v2307_v51  ;;  %2494 = vst.msk [vmem:[%s4596_s11 + $0x80] sm:$0xff] %vm2477_vm6, %v2461_v38 }
 0x26d   : > { %v3490_v15 = vpop.eup %3489  ;;  %v2306_v39 = vadd.f32 1.0, %v3488_v50  ;;  %3509 = vpow2.f32 %v2830_v47  ;;  %v2829_v31 = vmul.f32 -1.442695, %v4784_v58 }
 0x26e   : > { %v3492_v19 = vpop.eup %3491  ;;  %v2850_v24 = vadd.f32 -0.001, %v2397_v43  ;;  %v2396_v42 = vmul.f32 1.002, %v3490_v15 }
 0x26f   : > { %v2399_v27 = vmul.f32 1.002, %v3492_v19  ;;  %3511 = vrcp.f32 %v2306_v39 }
 0x270   : > { %v2464_v25 = vsel %vm2444_vm2, %v4672_v30, %v2850_v24  ;;  %v2849_v49 = vadd.f32 -0.001, %v2396_v42  ;;  %3513 = vpow2.f32 %v2829_v31 }
 0x271   : > { %v3494_v59 = vpop.eup %3493  ;;  %2497 = vst.msk [vmem:[%s4596_s11 + $0x98] sm:$0xff] %vm2477_vm6, %v2464_v25  ;;  %v2852_v53 = vadd.f32 -0.001, %v2399_v27 }
 0x272   : > { %v3496_v26 = vpop.eup %3495  ;;  %v2463_v4 = vsel %vm2444_vm2, %v4676_v9, %v2849_v49  ;;  %v2309_v34 = vadd.f32 1.0, %v3494_v59 }
 0x273   : > { %v3498_v55 = vpop.eup %3497  ;;  %2496 = vst.msk [vmem:[%s4596_s11 + $0x90] sm:$0xff] %vm2477_vm6, %v2463_v4  ;;  %v2466_v5 = vsel %vm2444_vm2, %v4680_v45, %v2852_v53  ;;  %v2398_v30 = vmul.f32 1.002, %v3496_v26 }
 0x274   : > { %v3500_v40 = vpop.eup %3499  ;;  %2499 = vst.msk [vmem:[%s4596_s11 + $0xa8] sm:$0xff] %vm2477_vm6, %v2466_v5  ;;  %3515 = vrcp.f32 %v2309_v34  ;;  %v2308_v37 = vadd.f32 1.0, %v3498_v55 }
 0x275   : > { %v3502_v13 = vpop.eup %3501  ;;  %v2851_v44 = vadd.f32 -0.001, %v2398_v30  ;;  %v2311_v12 = vadd.f32 1.0, %v3500_v40 }
 0x276   : > { %v3504_v9 = vpop.eup %3503  ;;  %v2401_v41 = vmul.f32 1.002, %v3502_v13  ;;  %3517 = vrcp.f32 %v2308_v37 }
 0x277   : > { %v2465_v23 = vsel %vm2444_vm2, %v4689_v28, %v2851_v44  ;;  %3519 = vrcp.f32 %v2311_v12  ;;  %v2310_v45 = vadd.f32 1.0, %v3504_v9  ;;  %v3506_v61 = vpop.eup %3505 }
 0x278   : > { %2498 = vst.msk [vmem:[%s4596_s11 + $0xa0] sm:$0xff] %vm2477_vm6, %v2465_v23  ;;  %v2854_v22 = vadd.f32 -0.001, %v2401_v41  ;;  %v2400_v63 = vmul.f32 1.002, %v3506_v61 }
 0x279   : > { %v3508_v1 = vpop.eup %3507  ;;  %3521 = vrcp.f32 %v2310_v45 }
 0x27a   : > { %v2468_v2 = vsel %vm2444_vm2, %v4706_v17, %v2854_v22  ;;  %v2403_v18 = vmul.f32 1.002, %v3508_v1  ;;  %v3510_v20 = vpop.eup %3509  ;;  %v2853_v28 = vadd.f32 -0.001, %v2400_v63 }
 0x27b   : > { %2501 = vst.msk [vmem:[%s4596_s11 + $0xb8] sm:$0xff] %vm2477_vm6, %v2468_v2  ;;  %v2313_v16 = vadd.f32 1.0, %v3510_v20 }
 0x27c   : > { %v3512_v0 = vpop.eup %3511  ;;  %v2856_v52 = vadd.f32 -0.001, %v2403_v18  ;;  %v2467_v62 = vsel %vm2444_vm2, %v4712_v54, %v2853_v28 }
 0x27d   : > { %v2402_v29 = vmul.f32 1.002, %v3512_v0  ;;  %v3514_v36 = vpop.eup %3513  ;;  %2500 = vst.msk [vmem:[%s4596_s11 + $0xb0] sm:$0xff] %vm2477_vm6, %v2467_v62  ;;  %3523 = vrcp.f32 %v2313_v16 }
 0x27e   : > { %v2470_v17 = vsel %vm2444_vm2, %v4716_v3, %v2856_v52  ;;  %v2312_v21 = vadd.f32 1.0, %v3514_v36 }
 0x27f   : > { %2503 = vst.msk [vmem:[%s4596_s11 + $0xc8] sm:$0xff] %vm2477_vm6, %v2470_v17  ;;  %v2855_v32 = vadd.f32 -0.001, %v2402_v29 }
 0x280   : > { %3525 = vrcp.f32 %v2312_v21 }
 0x281   : > { %v3516_v8 = vpop.eup %3515  ;;  %v2469_v33 = vsel %vm2444_vm2, %v4725_v11, %v2855_v32 }
 0x282   : > { %2502 = vst.msk [vmem:[%s4596_s11 + $0xc0] sm:$0xff] %vm2477_vm6, %v2469_v33  ;;  %v2405_v54 = vmul.f32 1.002, %v3516_v8 }
 0x283   : > { %v3518_v35 = vpop.eup %3517 }
 0x284   : > { %v3520_v6 = vpop.eup %3519  ;;  %v2858_v3 = vadd.f32 -0.001, %v2405_v54  ;;  %v2404_v51 = vmul.f32 1.002, %v3518_v35 }
 0x285   : > { %v2407_v48 = vmul.f32 1.002, %v3520_v6 }
 0x286   : > { %v3522_v10 = vpop.eup %3521  ;;  %v2472_v50 = vsel %vm2444_vm2, %v4739_v14, %v2858_v3  ;;  %v2857_v38 = vadd.f32 -0.001, %v2404_v51 }
 0x287   : > { %2505 = vst.msk [vmem:[%s4596_s11 + $0xd8] sm:$0xff] %vm2477_vm6, %v2472_v50  ;;  %v2860_v11 = vadd.f32 -0.001, %v2407_v48  ;;  %v2406_v43 = vmul.f32 1.002, %v3522_v10 }
 0x288   : > { %v2471_v47 = vsel %vm2444_vm2, %v4745_v56, %v2857_v38 }
 0x289   : > { %2504 = vst.msk [vmem:[%s4596_s11 + $0xd0] sm:$0xff] %vm2477_vm6, %v2471_v47  ;;  %v2474_v15 = vsel %vm2444_vm2, %v4752_v7, %v2860_v11  ;;  %v2859_v39 = vadd.f32 -0.001, %v2406_v43 }
 0x28a   : > { %2507 = vst.msk [vmem:[%s4596_s11 + $0xe8] sm:$0xff] %vm2477_vm6, %v2474_v15  ;;  %v3524_v14 = vpop.eup %3523 }
 0x28b   : > { %v2473_v19 = vsel %vm2444_vm2, %v4759_v60, %v2859_v39  ;;  %v2409_v24 = vmul.f32 1.002, %v3524_v14 }
 0x28c   : > { %2506 = vst.msk [vmem:[%s4596_s11 + $0xe0] sm:$0xff] %vm2477_vm6, %v2473_v19 }
 0x28d   : > { %v3526_v42 = vpop.eup %3525  ;;  %v2862_v56 = vadd.f32 -0.001, %v2409_v24 }
 0x28e   : > { %v2408_v27 = vmul.f32 1.002, %v3526_v42 }
 0x28f   : > { %v2476_v31 = vsel %vm2444_vm2, %v4775_v57, %v2862_v56 }
 0x290   : > { %2509 = vst.msk [vmem:[%s4596_s11 + $0xf8] sm:$0xff] %vm2477_vm6, %v2476_v31  ;;  %v2861_v7 = vadd.f32 -0.001, %v2408_v27 }
 0x292   : > { %v2475_v25 = vsel %vm2444_vm2, %v4784_v58, %v2861_v7 }
 0x293   : > { %2508 = vst.msk [vmem:[%s4596_s11 + $0xf0] sm:$0xff] %vm2477_vm6, %v2475_v25 }
 0x294 PF: > { %s15_s20 = sadd.s32 1, %s3549_s20   ;;  %s4904_s18 = smov %s3545_s19 }
 0x295   : > { %p12_p5 = scmp.ge.s32.totalorder %s15_s20, 4   ;;  %s4905_s19 = smov %s4907_s21 }
 0x297   :  { %14 = sbr.rel (!%p12_p5) target bundleno = 2 (0x2), region = 72 }

</bundles_post_ra>
